<compile_context>
chip_gen: v7x
topology: tpu7x:2x2x1
jax: 0.10.0
libtpu: 0.0.40
codegen_flags: <defaults>
</compile_context>

<pallas_src>
import functools
import math

import jax
import jax.numpy as jnp
from jax.experimental import pallas as pl
from jax.experimental.pallas import tpu as pltpu


def _vmem_spec():
    return pl.BlockSpec(memory_space=pltpu.MemorySpace.VMEM)


# --------------------------------------------------------------------------
# Fused Pallas kernel: LSTM_attn + AttentionPooler(pos/neg) + ScoreCalculator
# --------------------------------------------------------------------------

def _recdap_kernel(support_ref, noise_ref, query_ref, negative_ref,
                   wih_ref, bih_ref, whhf_ref, whhb_ref, wout_ref, bout_ref,
                   qp_ref, wkv_ref, bkv_ref, wo_ref, bo_ref,
                   w1_ref, b1_ref, w2_ref, b2_ref, g_ref, be_ref,
                   whead_ref, bhead_ref, wtail_ref, btail_ref,
                   p_ref, n_ref,
                   *, B, F, D, H, NQ, NN):
    f32 = jnp.float32
    bf16 = jnp.bfloat16

    def mm(a, w_ref, b_ref=None):
        out = jnp.dot(a.astype(bf16), w_ref[...], preferred_element_type=f32)
        if b_ref is not None:
            out = out + b_ref[...]
        return out

    # ------------------ 1) relation learner (LSTM_attn) --------------------
    # Hoisted input projections: one matmul for all F steps, both directions,
    # all 4 gates.  Row order of x_all: t*B + b.  Column order of wih:
    # [fwd i|f|g|o | bwd i|f|g|o], each block H wide.  bih = b_ih + b_hh.
    x_all = jnp.concatenate([support_ref[:, t, :] for t in range(F)], axis=0)  # (F*B, 2D)
    xw = mm(x_all, wih_ref, bih_ref)                                           # (F*B, 8H)

    def run_direction(whh_ref, gate_off, time_order):
        h = None
        c = None
        hs = [None] * F
        for t in time_order:
            gates = xw[t * B:(t + 1) * B, gate_off:gate_off + 4 * H]           # (B, 4H)
            if h is not None:
                gates = gates + mm(h, whh_ref)                                 # recurrent term
            i = jax.nn.sigmoid(gates[:, 0:H])
            f = jax.nn.sigmoid(gates[:, H:2 * H])
            g = jnp.tanh(gates[:, 2 * H:3 * H])
            o = jax.nn.sigmoid(gates[:, 3 * H:4 * H])
            c = i * g if c is None else f * c + i * g
            h = o * jnp.tanh(c)
            hs[t] = h
        return hs, c

    h_fwd, c_fwd = run_direction(whhf_ref, 0, range(F))
    h_bwd, c_bwd = run_direction(whhb_ref, 4 * H, range(F - 1, -1, -1))

    outs = [jnp.concatenate([h_fwd[t], h_bwd[t]], axis=-1) for t in range(F)]  # (B, 2H)

    # torch `final_cell_state.view(-1, 2H, layers)` quirk: row-major flatten of
    # (2, B, H) regrouped into rows of 2H.  Built with static slices/concats
    # (robust lowering; B is tiny).
    cell_rows = ([c_fwd[b:b + 1, :] for b in range(B)]
                 + [c_bwd[b:b + 1, :] for b in range(B)])
    hidden = jnp.concatenate(
        [jnp.concatenate([cell_rows[2 * j], cell_rows[2 * j + 1]], axis=-1)
         for j in range(B)], axis=0)                                           # (B, 2H)

    # attention over time steps (softmax over F)
    w = jnp.concatenate(
        [jnp.sum(outs[t] * hidden, axis=-1, keepdims=True) for t in range(F)],
        axis=-1)                                                               # (B, F)
    m = jnp.max(w, axis=-1, keepdims=True)
    e = jnp.exp(w - m)
    a = e * pl.reciprocal(jnp.sum(e, axis=-1, keepdims=True), approx=True)

    ctx = a[:, 0:1] * outs[0]
    for t in range(1, F):
        ctx = ctx + a[:, t:t + 1] * outs[t]                                    # (B, 2H)

    rel2d = mm(ctx, wout_ref, bout_ref)                                        # (B, D)

    # ------------------ 2) AttentionPooler on z_pos / z_neg ----------------
    Dm = 2 * D
    N = 2 * B                       # pos + neg pools batched along rows
    L = F
    scale = 1.0 / math.sqrt(Dm)     # num_heads = 1 -> head_dim = Dm

    # Row order: l*N + n, with n < B -> z_pos[b, l], n >= B -> z_neg[b, l].
    x_flat = jnp.concatenate(
        [jnp.concatenate([noise_ref[:, l, :], noise_ref[:, F + l, :]], axis=0)
         for l in range(L)], axis=0)                                           # (L*N, Dm)
    kv = mm(x_flat, wkv_ref, bkv_ref)                                          # (L*N, 2Dm)

    qp = qp_ref[...]                                                           # (1, Dm)
    scores, vals = [], []
    for l in range(L):
        blk = kv[l * N:(l + 1) * N, :]
        k_l = blk[:, :Dm]
        vals.append(blk[:, Dm:])
        scores.append(jnp.sum(k_l * qp, axis=-1, keepdims=True) * scale)       # (N, 1)
    s = jnp.concatenate(scores, axis=-1)                                       # (N, L)
    ms = jnp.max(s, axis=-1, keepdims=True)
    es = jnp.exp(s - ms)
    aw = es * pl.reciprocal(jnp.sum(es, axis=-1, keepdims=True), approx=True)

    pooled_ctx = aw[:, 0:1] * vals[0]
    for l in range(1, L):
        pooled_ctx = pooled_ctx + aw[:, l:l + 1] * vals[l]                     # (N, Dm)

    attn_out = mm(pooled_ctx, wo_ref, bo_ref)
    h1 = jnp.maximum(mm(attn_out, w1_ref, b1_ref), 0.0)
    y = mm(h1, w2_ref, b2_ref)
    mu = jnp.mean(y, axis=-1, keepdims=True)
    var = jnp.mean((y - mu) * (y - mu), axis=-1, keepdims=True)
    pooled = g_ref[...] * (y - mu) * jax.lax.rsqrt(var + 1e-5) + be_ref[...]   # (N, Dm)

    z = jnp.concatenate([pooled[:B, :], pooled[B:, :]], axis=-1)               # (B, 4D)

    # ------------------ 3) ScoreCalculator ---------------------------------
    # head/tail computed once on the un-broadcast z; broadcast-add per (b, n).
    zh = mm(z, whead_ref, bhead_ref)                                           # (B, D)
    zt = mm(z, wtail_ref, btail_ref)                                           # (B, D)
    delta = zh + rel2d - zt                                                    # (B, D)

    def ent_scores(ent_ref, count):
        cols = []
        for j in range(count):
            pair = ent_ref[:, j, :]                                            # (B, 2D) = [e1|e2]
            dvec = pair[:, :D] - pair[:, D:] + delta                           # (B, D)
            cols.append(jnp.sum(dvec * dvec, axis=-1, keepdims=True))
        return -jnp.sqrt(jnp.concatenate(cols, axis=-1))                       # (B, count)

    p_ref[...] = ent_scores(query_ref, NQ)
    n_ref[...] = ent_scores(negative_ref, NN)


# --------------------------------------------------------------------------
# ReCDAP wrapper
# --------------------------------------------------------------------------

class ReCDAPPallas:
    def __init__(self, embed_dim=32, few=2, n_hidden=64, key=jax.random.PRNGKey(42)):
        self.D = embed_dim
        self.few = few
        self.H = n_hidden
        D, H = embed_dim, n_hidden
        Dm = 2 * D

        ks = iter(jax.random.split(key, 32))

        def w(shape, scale=0.1):
            return scale * jax.random.normal(next(ks), shape, jnp.float32)

        def wb(shape, scale=0.1):                      # bf16 matmul weights
            return w(shape, scale).astype(jnp.bfloat16)

        # ---- LSTM_attn (bidirectional, 1 layer); weights pre-transposed ----
        # input proj: [fwd i|f|g|o | bwd i|f|g|o] stacked along out dim.
        self.Wih = wb((2 * D, 8 * H))
        self.b_gates = w((1, 8 * H)) + w((1, 8 * H))   # b_ih + b_hh, both dirs
        self.Whh_f = wb((H, 4 * H))                    # gates stacked [i|f|g|o]
        self.Whh_b = wb((H, 4 * H))
        self.W_out = wb((2 * H, D))
        self.b_out = w((1, D))

        # ---- ScoreCalculator ----
        self.W_head = wb((4 * D, D)); self.b_head = w((1, D))
        self.W_tail = wb((4 * D, D)); self.b_tail = w((1, D))

        # ---- AttentionPooler (embed_dim = 2D, num_heads = 1) ----
        query_param = math.sqrt(2.0 / (1 + Dm)) * jax.random.normal(
            next(ks), (1, Dm), jnp.float32)            # xavier_normal_
        Wq = w((Dm, Dm)); bq = w((1, Dm))
        self.qp = query_param @ Wq + bq                # constant query proj, hoisted
        self.Wkv = wb((Dm, 2 * Dm))                    # fused [Wk | Wv]
        self.bkv = w((1, 2 * Dm))
        self.Wo = wb((Dm, Dm)); self.bo = w((1, Dm))
        self.mlp_w1 = wb((Dm, Dm)); self.mlp_b1 = w((1, Dm))
        self.mlp_w2 = wb((Dm, Dm)); self.mlp_b2 = w((1, Dm))
        self.ln_g = jnp.ones((1, Dm), jnp.float32)
        self.ln_b = jnp.zeros((1, Dm), jnp.float32)

    def __call__(self, support, support_negative, query, negative, rng):
        # TODO(synk): RelationalPathGNN definition was not provided; task tensors
        # are assumed to already be (B, n, 2, embed_dim) embeddings (identity GNN).
        B = support.shape[0]
        F, D = self.few, self.D
        NQ, NN = query.shape[1], negative.shape[1]

        # Free row-major reshapes only; all real layout work is in-kernel.
        support_r = support.reshape(B, F, 2 * D)
        query_r = query.reshape(B, NQ, 2 * D)
        negative_r = negative.reshape(B, NN, 2 * D)

        # TODO(synk): ConditionalUnet1D / DDPMScheduler definitions were not
        # provided; the diffusion denoising loop (and the training-path mse_loss)
        # cannot be translated.  Following the eval-mode structure, z_denoised is
        # the initial Gaussian noise on the padded target_r shape; global_cond and
        # support_negative (which only feed it) are unused.
        del support_negative
        noise = jax.random.normal(rng, (B, 2 * F + 2, 2 * D), jnp.float32)

        kernel = functools.partial(_recdap_kernel, B=B, F=F, D=D, H=self.H,
                                   NQ=NQ, NN=NN)
        p2, n2 = pl.pallas_call(
            kernel,
            out_shape=(jax.ShapeDtypeStruct((B, NQ), jnp.float32),
                       jax.ShapeDtypeStruct((B, NN), jnp.float32)),
            in_specs=[_vmem_spec() for _ in range(25)],
            out_specs=(_vmem_spec(), _vmem_spec()),
        )(support_r, noise, query_r, negative_r,
          self.Wih, self.b_gates, self.Whh_f, self.Whh_b, self.W_out, self.b_out,
          self.qp, self.Wkv, self.bkv, self.Wo, self.bo,
          self.mlp_w1, self.mlp_b1, self.mlp_w2, self.mlp_b2, self.ln_g, self.ln_b,
          self.W_head, self.b_head, self.W_tail, self.b_tail)

        # trailing size-1 reshape (free) to match torch score[:, :nq] shape (B, n, 1)
        return p2.reshape(B, NQ, 1), n2.reshape(B, NN, 1)


# --------------------------------------------------------------------------

if __name__ == "__main__":
    key = jax.random.PRNGKey(0)
    ks = jax.random.split(key, 6)

    B, D, F, NQ, NN = 2, 32, 2, 2, 2
    support = jax.random.normal(ks[0], (B, F, 2, D), jnp.float32)
    support_negative = jax.random.normal(ks[1], (B, F, 2, D), jnp.float32)
    query = jax.random.normal(ks[2], (B, NQ, 2, D), jnp.float32)
    negative = jax.random.normal(ks[3], (B, NN, 2, D), jnp.float32)

    model = ReCDAPPallas(embed_dim=D, few=F, n_hidden=64, key=ks[4])

    @jax.jit
    def forward(s, sn, q, n, rng):
        return model(s, sn, q, n, rng)

    p_score, n_score = forward(support, support_negative, query, negative, ks[5])
    jax.block_until_ready((p_score, n_score))

    assert p_score.shape == (B, NQ, 1), p_score.shape
    assert n_score.shape == (B, NN, 1), n_score.shape
    assert bool(jnp.all(jnp.isfinite(p_score))) and bool(jnp.all(jnp.isfinite(n_score)))
    print("KERNEL_OK")
</pallas_src>

<mosaic_0001>
module attributes {stable_mosaic.version = 11 : i64} {
  func.func @_recdap_kernel(%arg0: memref<2x2x64xf32, #tpu.memory_space<vmem>>, %arg1: memref<2x6x64xf32, #tpu.memory_space<vmem>>, %arg2: memref<2x2x64xf32, #tpu.memory_space<vmem>>, %arg3: memref<2x2x64xf32, #tpu.memory_space<vmem>>, %arg4: memref<64x512xbf16, #tpu.memory_space<vmem>>, %arg5: memref<1x512xf32, #tpu.memory_space<vmem>>, %arg6: memref<64x256xbf16, #tpu.memory_space<vmem>>, %arg7: memref<64x256xbf16, #tpu.memory_space<vmem>>, %arg8: memref<128x32xbf16, #tpu.memory_space<vmem>>, %arg9: memref<1x32xf32, #tpu.memory_space<vmem>>, %arg10: memref<1x64xf32, #tpu.memory_space<vmem>>, %arg11: memref<64x128xbf16, #tpu.memory_space<vmem>>, %arg12: memref<1x128xf32, #tpu.memory_space<vmem>>, %arg13: memref<64x64xbf16, #tpu.memory_space<vmem>>, %arg14: memref<1x64xf32, #tpu.memory_space<vmem>>, %arg15: memref<64x64xbf16, #tpu.memory_space<vmem>>, %arg16: memref<1x64xf32, #tpu.memory_space<vmem>>, %arg17: memref<64x64xbf16, #tpu.memory_space<vmem>>, %arg18: memref<1x64xf32, #tpu.memory_space<vmem>>, %arg19: memref<1x64xf32, #tpu.memory_space<vmem>>, %arg20: memref<1x64xf32, #tpu.memory_space<vmem>>, %arg21: memref<128x32xbf16, #tpu.memory_space<vmem>>, %arg22: memref<1x32xf32, #tpu.memory_space<vmem>>, %arg23: memref<128x32xbf16, #tpu.memory_space<vmem>>, %arg24: memref<1x32xf32, #tpu.memory_space<vmem>>, %arg25: memref<2x2xf32, #tpu.memory_space<vmem>>, %arg26: memref<2x2xf32, #tpu.memory_space<vmem>>) attributes {dimension_semantics = [], scalar_prefetch = 0 : i64, scratch_operands = 0 : i64, tpu.core_type = #tpu.core_type<tc>} {
    %c0 = arith.constant 0 : index
    %c0_0 = arith.constant 0 : index
    %c0_1 = arith.constant 0 : index
    %0 = vector.load %arg0[%c0, %c0_0, %c0_1] : memref<2x2x64xf32, #tpu.memory_space<vmem>>, vector<2x1x64xf32>
    %1 = vector.shape_cast %0 : vector<2x1x64xf32> to vector<2x64xf32>
    %c0_2 = arith.constant 0 : index
    %c1 = arith.constant 1 : index
    %c0_3 = arith.constant 0 : index
    %2 = vector.load %arg0[%c0_2, %c1, %c0_3] : memref<2x2x64xf32, #tpu.memory_space<vmem>>, vector<2x1x64xf32>
    %3 = vector.shape_cast %2 : vector<2x1x64xf32> to vector<2x64xf32>
    %4 = tpu.concatenate %1, %3 in 0 : vector<2x64xf32>, vector<2x64xf32> -> vector<4x64xf32>
    %5 = arith.truncf %4 : vector<4x64xf32> to vector<4x64xbf16>
    %c0_4 = arith.constant 0 : index
    %c0_5 = arith.constant 0 : index
    %6 = vector.load %arg4[%c0_4, %c0_5] : memref<64x512xbf16, #tpu.memory_space<vmem>>, vector<64x512xbf16>
    %cst = arith.constant dense<0.000000e+00> : vector<4x512xf32>
    %7 = tpu.matmul %5, %6, %cst {dimension_numbers = #tpu.dot_dimension_numbers<[1], [0], [0], [1], [0, 0, 1, 1], [], []>} : vector<4x64xbf16>, vector<64x512xbf16>, vector<4x512xf32> -> vector<4x512xf32>
    %c0_6 = arith.constant 0 : index
    %c0_7 = arith.constant 0 : index
    %8 = vector.load %arg5[%c0_6, %c0_7] : memref<1x512xf32, #tpu.memory_space<vmem>>, vector<1x512xf32>
    %9 = vector.broadcast %8 : vector<1x512xf32> to vector<4x512xf32>
    %10 = arith.addf %7, %9 : vector<4x512xf32>
    %11 = vector.extract_strided_slice %10 {offsets = [0, 0], sizes = [2, 256], strides = [1, 1]} : vector<4x512xf32> to vector<2x256xf32>
    %12 = vector.extract_strided_slice %11 {offsets = [0, 0], sizes = [2, 64], strides = [1, 1]} : vector<2x256xf32> to vector<2x64xf32>
    %13 = arith.negf %12 : vector<2x64xf32>
    %14 = math.exp %13 : vector<2x64xf32>
    %cst_8 = arith.constant 1.000000e+00 : f32
    %15 = vector.broadcast %cst_8 : f32 to vector<2x64xf32>
    %16 = arith.addf %15, %14 : vector<2x64xf32>
    %17 = arith.divf %15, %16 : vector<2x64xf32>
    %18 = vector.extract_strided_slice %11 {offsets = [0, 128], sizes = [2, 64], strides = [1, 1]} : vector<2x256xf32> to vector<2x64xf32>
    %19 = math.tanh %18 : vector<2x64xf32>
    %20 = vector.extract_strided_slice %11 {offsets = [0, 192], sizes = [2, 64], strides = [1, 1]} : vector<2x256xf32> to vector<2x64xf32>
    %21 = arith.negf %20 : vector<2x64xf32>
    %22 = math.exp %21 : vector<2x64xf32>
    %cst_9 = arith.constant 1.000000e+00 : f32
    %23 = vector.broadcast %cst_9 : f32 to vector<2x64xf32>
    %24 = arith.addf %23, %22 : vector<2x64xf32>
    %25 = arith.divf %23, %24 : vector<2x64xf32>
    %26 = arith.mulf %17, %19 : vector<2x64xf32>
    %27 = math.tanh %26 : vector<2x64xf32>
    %28 = arith.mulf %25, %27 : vector<2x64xf32>
    %29 = vector.extract_strided_slice %10 {offsets = [2, 0], sizes = [2, 256], strides = [1, 1]} : vector<4x512xf32> to vector<2x256xf32>
    %30 = arith.truncf %28 : vector<2x64xf32> to vector<2x64xbf16>
    %c0_10 = arith.constant 0 : index
    %c0_11 = arith.constant 0 : index
    %31 = vector.load %arg6[%c0_10, %c0_11] : memref<64x256xbf16, #tpu.memory_space<vmem>>, vector<64x256xbf16>
    %cst_12 = arith.constant dense<0.000000e+00> : vector<2x256xf32>
    %32 = tpu.matmul %30, %31, %cst_12 {dimension_numbers = #tpu.dot_dimension_numbers<[1], [0], [0], [1], [0, 0, 1, 1], [], []>} : vector<2x64xbf16>, vector<64x256xbf16>, vector<2x256xf32> -> vector<2x256xf32>
    %33 = arith.addf %29, %32 : vector<2x256xf32>
    %34 = vector.extract_strided_slice %33 {offsets = [0, 0], sizes = [2, 64], strides = [1, 1]} : vector<2x256xf32> to vector<2x64xf32>
    %35 = arith.negf %34 : vector<2x64xf32>
    %36 = math.exp %35 : vector<2x64xf32>
    %cst_13 = arith.constant 1.000000e+00 : f32
    %37 = vector.broadcast %cst_13 : f32 to vector<2x64xf32>
    %38 = arith.addf %37, %36 : vector<2x64xf32>
    %39 = arith.divf %37, %38 : vector<2x64xf32>
    %40 = vector.extract_strided_slice %33 {offsets = [0, 64], sizes = [2, 64], strides = [1, 1]} : vector<2x256xf32> to vector<2x64xf32>
    %41 = arith.negf %40 : vector<2x64xf32>
    %42 = math.exp %41 : vector<2x64xf32>
    %cst_14 = arith.constant 1.000000e+00 : f32
    %43 = vector.broadcast %cst_14 : f32 to vector<2x64xf32>
    %44 = arith.addf %43, %42 : vector<2x64xf32>
    %45 = arith.divf %43, %44 : vector<2x64xf32>
    %46 = vector.extract_strided_slice %33 {offsets = [0, 128], sizes = [2, 64], strides = [1, 1]} : vector<2x256xf32> to vector<2x64xf32>
    %47 = math.tanh %46 : vector<2x64xf32>
    %48 = vector.extract_strided_slice %33 {offsets = [0, 192], sizes = [2, 64], strides = [1, 1]} : vector<2x256xf32> to vector<2x64xf32>
    %49 = arith.negf %48 : vector<2x64xf32>
    %50 = math.exp %49 : vector<2x64xf32>
    %cst_15 = arith.constant 1.000000e+00 : f32
    %51 = vector.broadcast %cst_15 : f32 to vector<2x64xf32>
    %52 = arith.addf %51, %50 : vector<2x64xf32>
    %53 = arith.divf %51, %52 : vector<2x64xf32>
    %54 = arith.mulf %45, %26 : vector<2x64xf32>
    %55 = arith.mulf %39, %47 : vector<2x64xf32>
    %56 = arith.addf %54, %55 : vector<2x64xf32>
    %57 = math.tanh %56 : vector<2x64xf32>
    %58 = arith.mulf %53, %57 : vector<2x64xf32>
    %59 = vector.extract_strided_slice %10 {offsets = [2, 256], sizes = [2, 256], strides = [1, 1]} : vector<4x512xf32> to vector<2x256xf32>
    %60 = vector.extract_strided_slice %59 {offsets = [0, 0], sizes = [2, 64], strides = [1, 1]} : vector<2x256xf32> to vector<2x64xf32>
    %61 = arith.negf %60 : vector<2x64xf32>
    %62 = math.exp %61 : vector<2x64xf32>
    %cst_16 = arith.constant 1.000000e+00 : f32
    %63 = vector.broadcast %cst_16 : f32 to vector<2x64xf32>
    %64 = arith.addf %63, %62 : vector<2x64xf32>
    %65 = arith.divf %63, %64 : vector<2x64xf32>
    %66 = vector.extract_strided_slice %59 {offsets = [0, 128], sizes = [2, 64], strides = [1, 1]} : vector<2x256xf32> to vector<2x64xf32>
    %67 = math.tanh %66 : vector<2x64xf32>
    %68 = vector.extract_strided_slice %59 {offsets = [0, 192], sizes = [2, 64], strides = [1, 1]} : vector<2x256xf32> to vector<2x64xf32>
    %69 = arith.negf %68 : vector<2x64xf32>
    %70 = math.exp %69 : vector<2x64xf32>
    %cst_17 = arith.constant 1.000000e+00 : f32
    %71 = vector.broadcast %cst_17 : f32 to vector<2x64xf32>
    %72 = arith.addf %71, %70 : vector<2x64xf32>
    %73 = arith.divf %71, %72 : vector<2x64xf32>
    %74 = arith.mulf %65, %67 : vector<2x64xf32>
    %75 = math.tanh %74 : vector<2x64xf32>
    %76 = arith.mulf %73, %75 : vector<2x64xf32>
    %77 = vector.extract_strided_slice %10 {offsets = [0, 256], sizes = [2, 256], strides = [1, 1]} : vector<4x512xf32> to vector<2x256xf32>
    %78 = arith.truncf %76 : vector<2x64xf32> to vector<2x64xbf16>
    %c0_18 = arith.constant 0 : index
    %c0_19 = arith.constant 0 : index
    %79 = vector.load %arg7[%c0_18, %c0_19] : memref<64x256xbf16, #tpu.memory_space<vmem>>, vector<64x256xbf16>
    %cst_20 = arith.constant dense<0.000000e+00> : vector<2x256xf32>
    %80 = tpu.matmul %78, %79, %cst_20 {dimension_numbers = #tpu.dot_dimension_numbers<[1], [0], [0], [1], [0, 0, 1, 1], [], []>} : vector<2x64xbf16>, vector<64x256xbf16>, vector<2x256xf32> -> vector<2x256xf32>
    %81 = arith.addf %77, %80 : vector<2x256xf32>
    %82 = vector.extract_strided_slice %81 {offsets = [0, 0], sizes = [2, 64], strides = [1, 1]} : vector<2x256xf32> to vector<2x64xf32>
    %83 = arith.negf %82 : vector<2x64xf32>
    %84 = math.exp %83 : vector<2x64xf32>
    %cst_21 = arith.constant 1.000000e+00 : f32
    %85 = vector.broadcast %cst_21 : f32 to vector<2x64xf32>
    %86 = arith.addf %85, %84 : vector<2x64xf32>
    %87 = arith.divf %85, %86 : vector<2x64xf32>
    %88 = vector.extract_strided_slice %81 {offsets = [0, 64], sizes = [2, 64], strides = [1, 1]} : vector<2x256xf32> to vector<2x64xf32>
    %89 = arith.negf %88 : vector<2x64xf32>
    %90 = math.exp %89 : vector<2x64xf32>
    %cst_22 = arith.constant 1.000000e+00 : f32
    %91 = vector.broadcast %cst_22 : f32 to vector<2x64xf32>
    %92 = arith.addf %91, %90 : vector<2x64xf32>
    %93 = arith.divf %91, %92 : vector<2x64xf32>
    %94 = vector.extract_strided_slice %81 {offsets = [0, 128], sizes = [2, 64], strides = [1, 1]} : vector<2x256xf32> to vector<2x64xf32>
    %95 = math.tanh %94 : vector<2x64xf32>
    %96 = vector.extract_strided_slice %81 {offsets = [0, 192], sizes = [2, 64], strides = [1, 1]} : vector<2x256xf32> to vector<2x64xf32>
    %97 = arith.negf %96 : vector<2x64xf32>
    %98 = math.exp %97 : vector<2x64xf32>
    %cst_23 = arith.constant 1.000000e+00 : f32
    %99 = vector.broadcast %cst_23 : f32 to vector<2x64xf32>
    %100 = arith.addf %99, %98 : vector<2x64xf32>
    %101 = arith.divf %99, %100 : vector<2x64xf32>
    %102 = arith.mulf %93, %74 : vector<2x64xf32>
    %103 = arith.mulf %87, %95 : vector<2x64xf32>
    %104 = arith.addf %102, %103 : vector<2x64xf32>
    %105 = math.tanh %104 : vector<2x64xf32>
    %106 = arith.mulf %101, %105 : vector<2x64xf32>
    %107 = tpu.concatenate %28, %106 in 1 : vector<2x64xf32>, vector<2x64xf32> -> vector<2x128xf32>
    %108 = tpu.concatenate %58, %76 in 1 : vector<2x64xf32>, vector<2x64xf32> -> vector<2x128xf32>
    %109 = vector.extract_strided_slice %56 {offsets = [0, 0], sizes = [1, 64], strides = [1, 1]} : vector<2x64xf32> to vector<1x64xf32>
    %110 = vector.extract_strided_slice %56 {offsets = [1, 0], sizes = [1, 64], strides = [1, 1]} : vector<2x64xf32> to vector<1x64xf32>
    %111 = vector.extract_strided_slice %104 {offsets = [0, 0], sizes = [1, 64], strides = [1, 1]} : vector<2x64xf32> to vector<1x64xf32>
    %112 = vector.extract_strided_slice %104 {offsets = [1, 0], sizes = [1, 64], strides = [1, 1]} : vector<2x64xf32> to vector<1x64xf32>
    %113 = tpu.concatenate %109, %110 in 1 : vector<1x64xf32>, vector<1x64xf32> -> vector<1x128xf32>
    %114 = tpu.concatenate %111, %112 in 1 : vector<1x64xf32>, vector<1x64xf32> -> vector<1x128xf32>
    %115 = tpu.concatenate %113, %114 in 0 : vector<1x128xf32>, vector<1x128xf32> -> vector<2x128xf32>
    %116 = arith.mulf %107, %115 : vector<2x128xf32>
    %cst_24 = arith.constant dense<0.000000e+00> : vector<2xf32>
    %117 = vector.multi_reduction <add>, %116, %cst_24 [1] : vector<2x128xf32> to vector<2xf32>
    %118 = vector.shape_cast %117 : vector<2xf32> to vector<2x1xf32>
    %119 = arith.mulf %108, %115 : vector<2x128xf32>
    %cst_25 = arith.constant dense<0.000000e+00> : vector<2xf32>
    %120 = vector.multi_reduction <add>, %119, %cst_25 [1] : vector<2x128xf32> to vector<2xf32>
    %121 = vector.shape_cast %120 : vector<2xf32> to vector<2x1xf32>
    %122 = tpu.concatenate %118, %121 in 1 : vector<2x1xf32>, vector<2x1xf32> -> vector<2x2xf32>
    %cst_26 = arith.constant dense<0xFF800000> : vector<2xf32>
    %123 = vector.multi_reduction <maximumf>, %122, %cst_26 [1] : vector<2x2xf32> to vector<2xf32>
    %124 = vector.shape_cast %123 : vector<2xf32> to vector<2x1xf32>
    %125 = vector.broadcast %124 : vector<2x1xf32> to vector<2x2xf32>
    %126 = arith.subf %122, %125 : vector<2x2xf32>
    %127 = math.exp %126 : vector<2x2xf32>
    %cst_27 = arith.constant dense<0.000000e+00> : vector<2xf32>
    %128 = vector.multi_reduction <add>, %127, %cst_27 [1] : vector<2x2xf32> to vector<2xf32>
    %129 = vector.shape_cast %128 : vector<2xf32> to vector<2x1xf32>
    %130 = tpu.reciprocal %129 {approx = true} : vector<2x1xf32> -> vector<2x1xf32>
    %131 = vector.broadcast %130 : vector<2x1xf32> to vector<2x2xf32>
    %132 = arith.mulf %127, %131 : vector<2x2xf32>
    %133 = vector.extract_strided_slice %132 {offsets = [0, 0], sizes = [2, 1], strides = [1, 1]} : vector<2x2xf32> to vector<2x1xf32>
    %134 = vector.broadcast %133 : vector<2x1xf32> to vector<2x128xf32>
    %135 = arith.mulf %134, %107 : vector<2x128xf32>
    %136 = vector.extract_strided_slice %132 {offsets = [0, 1], sizes = [2, 1], strides = [1, 1]} : vector<2x2xf32> to vector<2x1xf32>
    %137 = vector.broadcast %136 : vector<2x1xf32> to vector<2x128xf32>
    %138 = arith.mulf %137, %108 : vector<2x128xf32>
    %139 = arith.addf %135, %138 : vector<2x128xf32>
    %140 = arith.truncf %139 : vector<2x128xf32> to vector<2x128xbf16>
    %c0_28 = arith.constant 0 : index
    %c0_29 = arith.constant 0 : index
    %141 = vector.load %arg8[%c0_28, %c0_29] : memref<128x32xbf16, #tpu.memory_space<vmem>>, vector<128x32xbf16>
    %cst_30 = arith.constant dense<0.000000e+00> : vector<2x32xf32>
    %142 = tpu.matmul %140, %141, %cst_30 {dimension_numbers = #tpu.dot_dimension_numbers<[1], [0], [0], [1], [0, 0, 1, 1], [], []>} : vector<2x128xbf16>, vector<128x32xbf16>, vector<2x32xf32> -> vector<2x32xf32>
    %c0_31 = arith.constant 0 : index
    %c0_32 = arith.constant 0 : index
    %143 = vector.load %arg9[%c0_31, %c0_32] : memref<1x32xf32, #tpu.memory_space<vmem>>, vector<1x32xf32>
    %144 = vector.broadcast %143 : vector<1x32xf32> to vector<2x32xf32>
    %145 = arith.addf %142, %144 : vector<2x32xf32>
    %c0_33 = arith.constant 0 : index
    %c0_34 = arith.constant 0 : index
    %c0_35 = arith.constant 0 : index
    %146 = vector.load %arg1[%c0_33, %c0_34, %c0_35] : memref<2x6x64xf32, #tpu.memory_space<vmem>>, vector<2x1x64xf32>
    %147 = vector.shape_cast %146 : vector<2x1x64xf32> to vector<2x64xf32>
    %c0_36 = arith.constant 0 : index
    %c2 = arith.constant 2 : index
    %c0_37 = arith.constant 0 : index
    %148 = vector.load %arg1[%c0_36, %c2, %c0_37] : memref<2x6x64xf32, #tpu.memory_space<vmem>>, vector<2x1x64xf32>
    %149 = vector.shape_cast %148 : vector<2x1x64xf32> to vector<2x64xf32>
    %150 = tpu.concatenate %147, %149 in 0 : vector<2x64xf32>, vector<2x64xf32> -> vector<4x64xf32>
    %c0_38 = arith.constant 0 : index
    %c1_39 = arith.constant 1 : index
    %c0_40 = arith.constant 0 : index
    %151 = vector.load %arg1[%c0_38, %c1_39, %c0_40] : memref<2x6x64xf32, #tpu.memory_space<vmem>>, vector<2x1x64xf32>
    %152 = vector.shape_cast %151 : vector<2x1x64xf32> to vector<2x64xf32>
    %c0_41 = arith.constant 0 : index
    %c3 = arith.constant 3 : index
    %c0_42 = arith.constant 0 : index
    %153 = vector.load %arg1[%c0_41, %c3, %c0_42] : memref<2x6x64xf32, #tpu.memory_space<vmem>>, vector<2x1x64xf32>
    %154 = vector.shape_cast %153 : vector<2x1x64xf32> to vector<2x64xf32>
    %155 = tpu.concatenate %152, %154 in 0 : vector<2x64xf32>, vector<2x64xf32> -> vector<4x64xf32>
    %156 = tpu.concatenate %150, %155 in 0 : vector<4x64xf32>, vector<4x64xf32> -> vector<8x64xf32>
    %157 = arith.truncf %156 : vector<8x64xf32> to vector<8x64xbf16>
    %c0_43 = arith.constant 0 : index
    %c0_44 = arith.constant 0 : index
    %158 = vector.load %arg11[%c0_43, %c0_44] : memref<64x128xbf16, #tpu.memory_space<vmem>>, vector<64x128xbf16>
    %cst_45 = arith.constant dense<0.000000e+00> : vector<8x128xf32>
    %159 = tpu.matmul %157, %158, %cst_45 {dimension_numbers = #tpu.dot_dimension_numbers<[1], [0], [0], [1], [0, 0, 1, 1], [], []>} : vector<8x64xbf16>, vector<64x128xbf16>, vector<8x128xf32> -> vector<8x128xf32>
    %c0_46 = arith.constant 0 : index
    %c0_47 = arith.constant 0 : index
    %160 = vector.load %arg12[%c0_46, %c0_47] : memref<1x128xf32, #tpu.memory_space<vmem>>, vector<1x128xf32>
    %161 = vector.broadcast %160 : vector<1x128xf32> to vector<8x128xf32>
    %162 = arith.addf %159, %161 : vector<8x128xf32>
    %c0_48 = arith.constant 0 : index
    %c0_49 = arith.constant 0 : index
    %163 = vector.load %arg10[%c0_48, %c0_49] : memref<1x64xf32, #tpu.memory_space<vmem>>, vector<1x64xf32>
    %164 = vector.extract_strided_slice %162 {offsets = [0, 0], sizes = [4, 128], strides = [1, 1]} : vector<8x128xf32> to vector<4x128xf32>
    %165 = vector.extract_strided_slice %164 {offsets = [0, 0], sizes = [4, 64], strides = [1, 1]} : vector<4x128xf32> to vector<4x64xf32>
    %166 = vector.extract_strided_slice %164 {offsets = [0, 64], sizes = [4, 64], strides = [1, 1]} : vector<4x128xf32> to vector<4x64xf32>
    %167 = vector.broadcast %163 : vector<1x64xf32> to vector<4x64xf32>
    %168 = arith.mulf %165, %167 : vector<4x64xf32>
    %cst_50 = arith.constant dense<0.000000e+00> : vector<4xf32>
    %169 = vector.multi_reduction <add>, %168, %cst_50 [1] : vector<4x64xf32> to vector<4xf32>
    %170 = vector.shape_cast %169 : vector<4xf32> to vector<4x1xf32>
    %cst_51 = arith.constant 1.250000e-01 : f32
    %171 = vector.broadcast %cst_51 : f32 to vector<4x1xf32>
    %172 = arith.mulf %170, %171 : vector<4x1xf32>
    %173 = vector.extract_strided_slice %162 {offsets = [4, 0], sizes = [4, 128], strides = [1, 1]} : vector<8x128xf32> to vector<4x128xf32>
    %174 = vector.extract_strided_slice %173 {offsets = [0, 0], sizes = [4, 64], strides = [1, 1]} : vector<4x128xf32> to vector<4x64xf32>
    %175 = vector.extract_strided_slice %173 {offsets = [0, 64], sizes = [4, 64], strides = [1, 1]} : vector<4x128xf32> to vector<4x64xf32>
    %176 = vector.broadcast %163 : vector<1x64xf32> to vector<4x64xf32>
    %177 = arith.mulf %174, %176 : vector<4x64xf32>
    %cst_52 = arith.constant dense<0.000000e+00> : vector<4xf32>
    %178 = vector.multi_reduction <add>, %177, %cst_52 [1] : vector<4x64xf32> to vector<4xf32>
    %179 = vector.shape_cast %178 : vector<4xf32> to vector<4x1xf32>
    %cst_53 = arith.constant 1.250000e-01 : f32
    %180 = vector.broadcast %cst_53 : f32 to vector<4x1xf32>
    %181 = arith.mulf %179, %180 : vector<4x1xf32>
    %182 = tpu.concatenate %172, %181 in 1 : vector<4x1xf32>, vector<4x1xf32> -> vector<4x2xf32>
    %cst_54 = arith.constant dense<0xFF800000> : vector<4xf32>
    %183 = vector.multi_reduction <maximumf>, %182, %cst_54 [1] : vector<4x2xf32> to vector<4xf32>
    %184 = vector.shape_cast %183 : vector<4xf32> to vector<4x1xf32>
    %185 = vector.broadcast %184 : vector<4x1xf32> to vector<4x2xf32>
    %186 = arith.subf %182, %185 : vector<4x2xf32>
    %187 = math.exp %186 : vector<4x2xf32>
    %cst_55 = arith.constant dense<0.000000e+00> : vector<4xf32>
    %188 = vector.multi_reduction <add>, %187, %cst_55 [1] : vector<4x2xf32> to vector<4xf32>
    %189 = vector.shape_cast %188 : vector<4xf32> to vector<4x1xf32>
    %190 = tpu.reciprocal %189 {approx = true} : vector<4x1xf32> -> vector<4x1xf32>
    %191 = vector.broadcast %190 : vector<4x1xf32> to vector<4x2xf32>
    %192 = arith.mulf %187, %191 : vector<4x2xf32>
    %193 = vector.extract_strided_slice %192 {offsets = [0, 0], sizes = [4, 1], strides = [1, 1]} : vector<4x2xf32> to vector<4x1xf32>
    %194 = vector.broadcast %193 : vector<4x1xf32> to vector<4x64xf32>
    %195 = arith.mulf %194, %166 : vector<4x64xf32>
    %196 = vector.extract_strided_slice %192 {offsets = [0, 1], sizes = [4, 1], strides = [1, 1]} : vector<4x2xf32> to vector<4x1xf32>
    %197 = vector.broadcast %196 : vector<4x1xf32> to vector<4x64xf32>
    %198 = arith.mulf %197, %175 : vector<4x64xf32>
    %199 = arith.addf %195, %198 : vector<4x64xf32>
    %200 = arith.truncf %199 : vector<4x64xf32> to vector<4x64xbf16>
    %c0_56 = arith.constant 0 : index
    %c0_57 = arith.constant 0 : index
    %201 = vector.load %arg13[%c0_56, %c0_57] : memref<64x64xbf16, #tpu.memory_space<vmem>>, vector<64x64xbf16>
    %cst_58 = arith.constant dense<0.000000e+00> : vector<4x64xf32>
    %202 = tpu.matmul %200, %201, %cst_58 {dimension_numbers = #tpu.dot_dimension_numbers<[1], [0], [0], [1], [0, 0, 1, 1], [], []>} : vector<4x64xbf16>, vector<64x64xbf16>, vector<4x64xf32> -> vector<4x64xf32>
    %c0_59 = arith.constant 0 : index
    %c0_60 = arith.constant 0 : index
    %203 = vector.load %arg14[%c0_59, %c0_60] : memref<1x64xf32, #tpu.memory_space<vmem>>, vector<1x64xf32>
    %204 = vector.broadcast %203 : vector<1x64xf32> to vector<4x64xf32>
    %205 = arith.addf %202, %204 : vector<4x64xf32>
    %206 = arith.truncf %205 : vector<4x64xf32> to vector<4x64xbf16>
    %c0_61 = arith.constant 0 : index
    %c0_62 = arith.constant 0 : index
    %207 = vector.load %arg15[%c0_61, %c0_62] : memref<64x64xbf16, #tpu.memory_space<vmem>>, vector<64x64xbf16>
    %cst_63 = arith.constant dense<0.000000e+00> : vector<4x64xf32>
    %208 = tpu.matmul %206, %207, %cst_63 {dimension_numbers = #tpu.dot_dimension_numbers<[1], [0], [0], [1], [0, 0, 1, 1], [], []>} : vector<4x64xbf16>, vector<64x64xbf16>, vector<4x64xf32> -> vector<4x64xf32>
    %c0_64 = arith.constant 0 : index
    %c0_65 = arith.constant 0 : index
    %209 = vector.load %arg16[%c0_64, %c0_65] : memref<1x64xf32, #tpu.memory_space<vmem>>, vector<1x64xf32>
    %210 = vector.broadcast %209 : vector<1x64xf32> to vector<4x64xf32>
    %211 = arith.addf %208, %210 : vector<4x64xf32>
    %cst_66 = arith.constant 0.000000e+00 : f32
    %212 = vector.broadcast %cst_66 : f32 to vector<4x64xf32>
    %213 = arith.maximumf %211, %212 : vector<4x64xf32>
    %214 = arith.truncf %213 : vector<4x64xf32> to vector<4x64xbf16>
    %c0_67 = arith.constant 0 : index
    %c0_68 = arith.constant 0 : index
    %215 = vector.load %arg17[%c0_67, %c0_68] : memref<64x64xbf16, #tpu.memory_space<vmem>>, vector<64x64xbf16>
    %cst_69 = arith.constant dense<0.000000e+00> : vector<4x64xf32>
    %216 = tpu.matmul %214, %215, %cst_69 {dimension_numbers = #tpu.dot_dimension_numbers<[1], [0], [0], [1], [0, 0, 1, 1], [], []>} : vector<4x64xbf16>, vector<64x64xbf16>, vector<4x64xf32> -> vector<4x64xf32>
    %c0_70 = arith.constant 0 : index
    %c0_71 = arith.constant 0 : index
    %217 = vector.load %arg18[%c0_70, %c0_71] : memref<1x64xf32, #tpu.memory_space<vmem>>, vector<1x64xf32>
    %218 = vector.broadcast %217 : vector<1x64xf32> to vector<4x64xf32>
    %219 = arith.addf %216, %218 : vector<4x64xf32>
    %cst_72 = arith.constant dense<0.000000e+00> : vector<4xf32>
    %220 = vector.multi_reduction <add>, %219, %cst_72 [1] : vector<4x64xf32> to vector<4xf32>
    %221 = vector.shape_cast %220 : vector<4xf32> to vector<4x1xf32>
    %cst_73 = arith.constant 6.400000e+01 : f32
    %222 = vector.broadcast %cst_73 : f32 to vector<4x1xf32>
    %223 = arith.divf %221, %222 : vector<4x1xf32>
    %224 = vector.broadcast %223 : vector<4x1xf32> to vector<4x64xf32>
    %225 = arith.subf %219, %224 : vector<4x64xf32>
    %226 = vector.broadcast %223 : vector<4x1xf32> to vector<4x64xf32>
    %227 = arith.subf %219, %226 : vector<4x64xf32>
    %228 = arith.mulf %225, %227 : vector<4x64xf32>
    %cst_74 = arith.constant dense<0.000000e+00> : vector<4xf32>
    %229 = vector.multi_reduction <add>, %228, %cst_74 [1] : vector<4x64xf32> to vector<4xf32>
    %230 = vector.shape_cast %229 : vector<4xf32> to vector<4x1xf32>
    %cst_75 = arith.constant 6.400000e+01 : f32
    %231 = vector.broadcast %cst_75 : f32 to vector<4x1xf32>
    %232 = arith.divf %230, %231 : vector<4x1xf32>
    %c0_76 = arith.constant 0 : index
    %c0_77 = arith.constant 0 : index
    %233 = vector.load %arg19[%c0_76, %c0_77] : memref<1x64xf32, #tpu.memory_space<vmem>>, vector<1x64xf32>
    %234 = vector.broadcast %223 : vector<4x1xf32> to vector<4x64xf32>
    %235 = arith.subf %219, %234 : vector<4x64xf32>
    %236 = vector.broadcast %233 : vector<1x64xf32> to vector<4x64xf32>
    %237 = arith.mulf %236, %235 : vector<4x64xf32>
    %cst_78 = arith.constant 9.99999974E-6 : f32
    %238 = vector.broadcast %cst_78 : f32 to vector<4x1xf32>
    %239 = arith.addf %232, %238 : vector<4x1xf32>
    %240 = math.rsqrt %239 : vector<4x1xf32>
    %241 = vector.broadcast %240 : vector<4x1xf32> to vector<4x64xf32>
    %242 = arith.mulf %237, %241 : vector<4x64xf32>
    %c0_79 = arith.constant 0 : index
    %c0_80 = arith.constant 0 : index
    %243 = vector.load %arg20[%c0_79, %c0_80] : memref<1x64xf32, #tpu.memory_space<vmem>>, vector<1x64xf32>
    %244 = vector.broadcast %243 : vector<1x64xf32> to vector<4x64xf32>
    %245 = arith.addf %242, %244 : vector<4x64xf32>
    %246 = vector.extract_strided_slice %245 {offsets = [0, 0], sizes = [2, 64], strides = [1, 1]} : vector<4x64xf32> to vector<2x64xf32>
    %247 = vector.extract_strided_slice %245 {offsets = [2, 0], sizes = [2, 64], strides = [1, 1]} : vector<4x64xf32> to vector<2x64xf32>
    %248 = tpu.concatenate %246, %247 in 1 : vector<2x64xf32>, vector<2x64xf32> -> vector<2x128xf32>
    %249 = arith.truncf %248 : vector<2x128xf32> to vector<2x128xbf16>
    %c0_81 = arith.constant 0 : index
    %c0_82 = arith.constant 0 : index
    %250 = vector.load %arg21[%c0_81, %c0_82] : memref<128x32xbf16, #tpu.memory_space<vmem>>, vector<128x32xbf16>
    %cst_83 = arith.constant dense<0.000000e+00> : vector<2x32xf32>
    %251 = tpu.matmul %249, %250, %cst_83 {dimension_numbers = #tpu.dot_dimension_numbers<[1], [0], [0], [1], [0, 0, 1, 1], [], []>} : vector<2x128xbf16>, vector<128x32xbf16>, vector<2x32xf32> -> vector<2x32xf32>
    %c0_84 = arith.constant 0 : index
    %c0_85 = arith.constant 0 : index
    %252 = vector.load %arg22[%c0_84, %c0_85] : memref<1x32xf32, #tpu.memory_space<vmem>>, vector<1x32xf32>
    %253 = vector.broadcast %252 : vector<1x32xf32> to vector<2x32xf32>
    %254 = arith.addf %251, %253 : vector<2x32xf32>
    %255 = arith.truncf %248 : vector<2x128xf32> to vector<2x128xbf16>
    %c0_86 = arith.constant 0 : index
    %c0_87 = arith.constant 0 : index
    %256 = vector.load %arg23[%c0_86, %c0_87] : memref<128x32xbf16, #tpu.memory_space<vmem>>, vector<128x32xbf16>
    %cst_88 = arith.constant dense<0.000000e+00> : vector<2x32xf32>
    %257 = tpu.matmul %255, %256, %cst_88 {dimension_numbers = #tpu.dot_dimension_numbers<[1], [0], [0], [1], [0, 0, 1, 1], [], []>} : vector<2x128xbf16>, vector<128x32xbf16>, vector<2x32xf32> -> vector<2x32xf32>
    %c0_89 = arith.constant 0 : index
    %c0_90 = arith.constant 0 : index
    %258 = vector.load %arg24[%c0_89, %c0_90] : memref<1x32xf32, #tpu.memory_space<vmem>>, vector<1x32xf32>
    %259 = vector.broadcast %258 : vector<1x32xf32> to vector<2x32xf32>
    %260 = arith.addf %257, %259 : vector<2x32xf32>
    %261 = arith.addf %254, %145 : vector<2x32xf32>
    %262 = arith.subf %261, %260 : vector<2x32xf32>
    %c0_91 = arith.constant 0 : index
    %c0_92 = arith.constant 0 : index
    %c0_93 = arith.constant 0 : index
    %263 = vector.load %arg2[%c0_91, %c0_92, %c0_93] : memref<2x2x64xf32, #tpu.memory_space<vmem>>, vector<2x1x64xf32>
    %264 = vector.shape_cast %263 : vector<2x1x64xf32> to vector<2x64xf32>
    %265 = vector.extract_strided_slice %264 {offsets = [0, 0], sizes = [2, 32], strides = [1, 1]} : vector<2x64xf32> to vector<2x32xf32>
    %266 = vector.extract_strided_slice %264 {offsets = [0, 32], sizes = [2, 32], strides = [1, 1]} : vector<2x64xf32> to vector<2x32xf32>
    %267 = arith.subf %265, %266 : vector<2x32xf32>
    %268 = arith.addf %267, %262 : vector<2x32xf32>
    %269 = arith.mulf %268, %268 : vector<2x32xf32>
    %cst_94 = arith.constant dense<0.000000e+00> : vector<2xf32>
    %270 = vector.multi_reduction <add>, %269, %cst_94 [1] : vector<2x32xf32> to vector<2xf32>
    %271 = vector.shape_cast %270 : vector<2xf32> to vector<2x1xf32>
    %c0_95 = arith.constant 0 : index
    %c1_96 = arith.constant 1 : index
    %c0_97 = arith.constant 0 : index
    %272 = vector.load %arg2[%c0_95, %c1_96, %c0_97] : memref<2x2x64xf32, #tpu.memory_space<vmem>>, vector<2x1x64xf32>
    %273 = vector.shape_cast %272 : vector<2x1x64xf32> to vector<2x64xf32>
    %274 = vector.extract_strided_slice %273 {offsets = [0, 0], sizes = [2, 32], strides = [1, 1]} : vector<2x64xf32> to vector<2x32xf32>
    %275 = vector.extract_strided_slice %273 {offsets = [0, 32], sizes = [2, 32], strides = [1, 1]} : vector<2x64xf32> to vector<2x32xf32>
    %276 = arith.subf %274, %275 : vector<2x32xf32>
    %277 = arith.addf %276, %262 : vector<2x32xf32>
    %278 = arith.mulf %277, %277 : vector<2x32xf32>
    %cst_98 = arith.constant dense<0.000000e+00> : vector<2xf32>
    %279 = vector.multi_reduction <add>, %278, %cst_98 [1] : vector<2x32xf32> to vector<2xf32>
    %280 = vector.shape_cast %279 : vector<2xf32> to vector<2x1xf32>
    %281 = tpu.concatenate %271, %280 in 1 : vector<2x1xf32>, vector<2x1xf32> -> vector<2x2xf32>
    %282 = math.sqrt %281 : vector<2x2xf32>
    %cst_99 = arith.constant 0.000000e+00 : f32
    %283 = vector.broadcast %cst_99 : f32 to vector<2x2xf32>
    %284 = arith.subf %283, %282 : vector<2x2xf32>
    %c0_100 = arith.constant 0 : index
    %c0_101 = arith.constant 0 : index
    %285 = vector.load %arg25[%c0_100, %c0_101] : memref<2x2xf32, #tpu.memory_space<vmem>>, vector<2x2xf32>
    tpu.vector_store %arg25[%c0_100, %c0_101], %284 {strides = array<i32>} : memref<2x2xf32, #tpu.memory_space<vmem>>, vector<2x2xf32>,
    %c0_102 = arith.constant 0 : index
    %c0_103 = arith.constant 0 : index
    %c0_104 = arith.constant 0 : index
    %286 = vector.load %arg3[%c0_102, %c0_103, %c0_104] : memref<2x2x64xf32, #tpu.memory_space<vmem>>, vector<2x1x64xf32>
    %287 = vector.shape_cast %286 : vector<2x1x64xf32> to vector<2x64xf32>
    %288 = vector.extract_strided_slice %287 {offsets = [0, 0], sizes = [2, 32], strides = [1, 1]} : vector<2x64xf32> to vector<2x32xf32>
    %289 = vector.extract_strided_slice %287 {offsets = [0, 32], sizes = [2, 32], strides = [1, 1]} : vector<2x64xf32> to vector<2x32xf32>
    %290 = arith.subf %288, %289 : vector<2x32xf32>
    %291 = arith.addf %290, %262 : vector<2x32xf32>
    %292 = arith.mulf %291, %291 : vector<2x32xf32>
    %cst_105 = arith.constant dense<0.000000e+00> : vector<2xf32>
    %293 = vector.multi_reduction <add>, %292, %cst_105 [1] : vector<2x32xf32> to vector<2xf32>
    %294 = vector.shape_cast %293 : vector<2xf32> to vector<2x1xf32>
    %c0_106 = arith.constant 0 : index
    %c1_107 = arith.constant 1 : index
    %c0_108 = arith.constant 0 : index
    %295 = vector.load %arg3[%c0_106, %c1_107, %c0_108] : memref<2x2x64xf32, #tpu.memory_space<vmem>>, vector<2x1x64xf32>
    %296 = vector.shape_cast %295 : vector<2x1x64xf32> to vector<2x64xf32>
    %297 = vector.extract_strided_slice %296 {offsets = [0, 0], sizes = [2, 32], strides = [1, 1]} : vector<2x64xf32> to vector<2x32xf32>
    %298 = vector.extract_strided_slice %296 {offsets = [0, 32], sizes = [2, 32], strides = [1, 1]} : vector<2x64xf32> to vector<2x32xf32>
    %299 = arith.subf %297, %298 : vector<2x32xf32>
    %300 = arith.addf %299, %262 : vector<2x32xf32>
    %301 = arith.mulf %300, %300 : vector<2x32xf32>
    %cst_109 = arith.constant dense<0.000000e+00> : vector<2xf32>
    %302 = vector.multi_reduction <add>, %301, %cst_109 [1] : vector<2x32xf32> to vector<2xf32>
    %303 = vector.shape_cast %302 : vector<2xf32> to vector<2x1xf32>
    %304 = tpu.concatenate %294, %303 in 1 : vector<2x1xf32>, vector<2x1xf32> -> vector<2x2xf32>
    %305 = math.sqrt %304 : vector<2x2xf32>
    %cst_110 = arith.constant 0.000000e+00 : f32
    %306 = vector.broadcast %cst_110 : f32 to vector<2x2xf32>
    %307 = arith.subf %306, %305 : vector<2x2xf32>
    %c0_111 = arith.constant 0 : index
    %c0_112 = arith.constant 0 : index
    %308 = vector.load %arg26[%c0_111, %c0_112] : memref<2x2xf32, #tpu.memory_space<vmem>>, vector<2x2xf32>
    tpu.vector_store %arg26[%c0_111, %c0_112], %307 {strides = array<i32>} : memref<2x2xf32, #tpu.memory_space<vmem>>, vector<2x2xf32>,
    return
  }
}

</mosaic_0001>

<bundles_post_ra>
// kernel: forward.1
= control target key start
LH: loop header
LB: loop body
LE: loop exit
PB: predicated region body
PF: predicated region fallthrough
CT: control target
= control target key end

     0   :  { %s2744_s0 = inlined_call_operand.vmem [shape: f32[2,2,64], index: 0, kind: input, shape index: {}]   ;;  %s2745_s1 = inlined_call_operand.vmem [shape: f32[2,6,64], index: 1, kind: input, shape index: {}]   ;;  %s2746_s2 = inlined_call_operand.vmem [shape: f32[2,2,64], index: 2, kind: input, shape index: {}]   ;;  %s2747_s3 = inlined_call_operand.vmem [shape: f32[2,2,64], index: 3, kind: input, shape index: {}]   ;;  %s2748_s4 = inlined_call_operand.vmem [shape: bf16[64,512], index: 4, kind: input, shape index: {}]   ;;  %s2749_s5 = inlined_call_operand.vmem [shape: f32[1,512], index: 5, kind: input, shape index: {}]   ;;  %s2750_s6 = inlined_call_operand.vmem [shape: bf16[64,256], index: 6, kind: input, shape index: {}]   ;;  %s2751_s7 = inlined_call_operand.vmem [shape: bf16[64,256], index: 7, kind: input, shape index: {}]   ;;  %s2752_s8 = inlined_call_operand.vmem [shape: bf16[128,32], index: 8, kind: input, shape index: {}]   ;;  %s2753_s9 = inlined_call_operand.vmem [shape: f32[1,32], index: 9, kind: input, shape index: {}]   ;;  %s2754_s10 = inlined_call_operand.vmem [shape: f32[1,64], index: 10, kind: input, shape index: {}]   ;;  %s2755_s11 = inlined_call_operand.vmem [shape: bf16[64,128], index: 11, kind: input, shape index: {}]   ;;  %s2756_s12 = inlined_call_operand.vmem [shape: f32[1,128], index: 12, kind: input, shape index: {}]   ;;  %s2757_s13 = inlined_call_operand.vmem [shape: bf16[64,64], index: 13, kind: input, shape index: {}]   ;;  %s2758_s14 = inlined_call_operand.vmem [shape: f32[1,64], index: 14, kind: input, shape index: {}]   ;;  %s2759_s15 = inlined_call_operand.vmem [shape: bf16[64,64], index: 15, kind: input, shape index: {}]   ;;  %s2760_s16 = inlined_call_operand.vmem [shape: f32[1,64], index: 16, kind: input, shape index: {}]   ;;  %s2761_s17 = inlined_call_operand.vmem [shape: bf16[64,64], index: 17, kind: input, shape index: {}]   ;;  %s2762_s18 = inlined_call_operand.vmem [shape: f32[1,64], index: 18, kind: input, shape index: {}]   ;;  %s2763_s19 = inlined_call_operand.vmem [shape: f32[1,64], index: 19, kind: input, shape index: {}]   ;;  %s2764_s20 = inlined_call_operand.vmem [shape: f32[1,64], index: 20, kind: input, shape index: {}]   ;;  %s2765_s21 = inlined_call_operand.vmem [shape: bf16[128,32], index: 21, kind: input, shape index: {}]   ;;  %s2766_s22 = inlined_call_operand.vmem [shape: f32[1,32], index: 22, kind: input, shape index: {}]   ;;  %s2767_s23 = inlined_call_operand.vmem [shape: bf16[128,32], index: 23, kind: input, shape index: {}]   ;;  %s2768_s24 = inlined_call_operand.vmem [shape: f32[1,32], index: 24, kind: input, shape index: {}]   ;;  %s2769_s25 = inlined_call_operand.hbm [shape: f32[2,2], index: 25, kind: output, shape index: {0}]   ;;  %s2770_s26 = inlined_call_operand.hbm [shape: f32[2,2], index: 26, kind: output, shape index: {1}]  }
   0x1   :  { %2779 = sst [smem:[#allocation8_spill]] %s2744_s0 }
   0x2   :  { %2780 = sst [smem:[#allocation9_spill]] %s2745_s1 }
   0x3   :  { %2781 = sst [smem:[#allocation10_spill]] %s2746_s2 }
   0x4   :  { %2782 = sst [smem:[#allocation11_spill]] %s2747_s3 }
   0x5   :  { %2783 = sst [smem:[#allocation12_spill]] %s2748_s4 }
   0x6   :  { %2784 = sst [smem:[#allocation13_spill]] %s2749_s5 }
   0x7   :  { %2785 = sst [smem:[#allocation14_spill]] %s2750_s6 }
   0x8   :  { %2786 = sst [smem:[#allocation15_spill]] %s2751_s7 }
   0x9   :  { %2787 = sst [smem:[#allocation16_spill]] %s2752_s8 }
   0xa   :  { %2788 = sst [smem:[#allocation17_spill]] %s2753_s9 }
   0xb   :  { %2789 = sst [smem:[#allocation18_spill]] %s2754_s10 }
   0xc   :  { %32 = vsyncpa [#allocation3], 0  ;;  %s2790_s7 = sld [smem:[#allocation12_spill]]  ;;  %v2099_v2 = vmov 0   ;;  %vm92_vm0 = vcmask 1041409   ;;  %s2791_s4 = sld [smem:[#allocation8_spill]] }
   0xd   :  { %259 = vmatprep.mubr.bf16.mxu0 %v2099_v2  ;;  %300 = vmatprep.mubr.bf16.mxu1 %v2099_v2  ;;  %vm99_vm1 = vcmask 1043459   ;;  %vm102_vm2 = vcmask 1041408   ;;  %vm223_vm3 = vcmask 523264  }
   0xe   :  { %1900 = vset.pattern.permute.xlu1 %v2099_v2 }
  0x12   :  { %v1901_v0 = vld [vmem:[%s2790_s7 + $0x4] ss:$16 sps:$4 sm:$0xff]   ;;  %v1903_v1 = vld [vmem:[%s2790_s7 + $0xc] ss:$16 sps:$4 sm:$0xff]   ;;  %v1905_v3 = vld [vmem:[%s2790_s7] ss:$16 sps:$4 sm:$0xff]  }
  0x13   :  { %227 = vmatprep.subr.bf16.mxu0 %v1901_v0  ;;  %v1906_v4 = vld [vmem:[%s2790_s7 + $0x8] ss:$16 sps:$4 sm:$0xff]   ;;  %268 = vmatprep.subr.bf16.mxu1 %v1903_v1  ;;  %v1907_v5 = vld [vmem:[%s2790_s7 + $0x24] ss:$16 sps:$4 sm:$0xff]   ;;  %v1909_v6 = vld [vmem:[%s2790_s7 + $0x2c] ss:$16 sps:$4 sm:$0xff]  }
  0x14   :  { %228 = vmatpush1.bf16.msra.mxu0 %v1905_v3  ;;  %269 = vmatpush1.bf16.msra.mxu1 %v1906_v4  ;;  %v1911_v7 = vld [vmem:[%s2790_s7 + $0x20] ss:$16 sps:$4 sm:$0xff]   ;;  %v1912_v8 = vld [vmem:[%s2790_s7 + $0x28] ss:$16 sps:$4 sm:$0xff]   ;;  %v1913_v9 = vld [vmem:[%s2790_s7 + $0x44] ss:$16 sps:$4 sm:$0xff]  }
  0x15   :  { %229 = vmatprep.subr.bf16.mxu0 %v1907_v5  ;;  %270 = vmatprep.subr.bf16.mxu1 %v1909_v6  ;;  %v1915_v10 = vld [vmem:[%s2790_s7 + $0x4c] ss:$16 sps:$4 sm:$0xff]   ;;  %v1917_v11 = vld [vmem:[%s2790_s7 + $0x40] ss:$16 sps:$4 sm:$0xff]   ;;  %v1918_v12 = vld [vmem:[%s2790_s7 + $0x48] ss:$16 sps:$4 sm:$0xff]  }
  0x16   :  { %v1919_v13 = vld [vmem:[%s2790_s7 + $0x64] ss:$16 sps:$4 sm:$0xff]   ;;  %v1921_v14 = vld [vmem:[%s2790_s7 + $0x6c] ss:$16 sps:$4 sm:$0xff]   ;;  %v1923_v15 = vld [vmem:[%s2790_s7 + $0x60] ss:$16 sps:$4 sm:$0xff]  }
  0x17   :  { %v85_v16 = vld [vmem:[%s2791_s4] sm:$0x1]  ;;  %v86_v17 = vld [vmem:[%s2791_s4 + $0x2] sm:$0x1]  ;;  %v87_v18 = vld [vmem:[%s2791_s4 + $0x1] sm:$0x1] }
  0x18   :  { %230 = vmatpush1.bf16.msra.mxu0 %v1911_v7  ;;  %271 = vmatpush1.bf16.msra.mxu1 %v1912_v8  ;;  %v88_v19 = vld [vmem:[%s2791_s4 + $0x3] sm:$0x1]  ;;  %v1924_v20 = vld [vmem:[%s2790_s7 + $0x68] ss:$16 sps:$4 sm:$0xff]   ;;  %v91_v21 = vrot.slane %v86_v17, 7  ;;  %v97_v22 = vrot.slane %v87_v18, 6 }
  0x19   :  { %231 = vmatprep.subr.bf16.mxu0 %v1913_v9  ;;  %272 = vmatprep.subr.bf16.mxu1 %v1915_v10  ;;  %v98_v23 = vrot.slane %v88_v19, 5 }
  0x1a   :  { %v93_v24 = vsel %vm92_vm0, %v91_v21, %v85_v16 }
  0x1b   :  { %v100_v25 = vsel %vm99_vm1, %v98_v23, %v97_v22 }
  0x1c   :  { %232 = vmatpush1.bf16.msra.mxu0 %v1917_v11  ;;  %273 = vmatpush1.bf16.msra.mxu1 %v1918_v12  ;;  %v103_v26 = vsel %vm102_vm2, %v93_v24, %v100_v25 }
  0x1d   :  { %233 = vmatprep.subr.bf16.mxu0 %v1919_v13  ;;  %274 = vmatprep.subr.bf16.mxu1 %v1921_v14  ;;  %v104_v27 = vpack.c.bf16 %v103_v26, %v103_v26 }
  0x20   :  { %234 = vmatpush1.bf16.msra.mxu0 %v1923_v15  ;;  %275 = vmatpush1.bf16.msra.mxu1 %v1924_v20 }
  0x23   :  { %1648 = vmatmul.mubr.msk.bf16.vlgmr.msra.gmra.mrb[0].mxu0 %vm223_vm3, %v104_v27  ;;  %1649 = vmatmul.mubr.msk.bf16.vlgmr.msra.gmra.mrb[0].mxu1 %vm223_vm3, %v104_v27 }
  0x24   :  { %416 = vmatprep.mubr.bf16.mxu0 %v2099_v2  ;;  %568 = vmatprep.mubr.bf16.mxu1 %v2099_v2 }
  0x25   :  { %33 = vsyncpa [#allocation5], 0  ;;  %v123_v28 = vlaneseq  ;;  %s2792_s27 = sld [smem:[#allocation13_spill]]  ;;  %s2793_s8 = sld [smem:[#allocation14_spill]]  ;;  %v2101_v23 = vmov 0.0   ;;  %vm2102_vm4 = vmmov 0  }
  0x26   :  { %s2794_s30 = sld [smem:[#allocation15_spill]]  ;;  %s2100_s5 = smov 64   ;;  %vm829_vm5 = vcmask 1043456   ;;  %vm927_vm6 = vcmask 523268   ;;  %vm922_vm7 = vcmask 519168   ;;  %vm653_vm8 = vcmask 7168  }
  0x27   :  { %v124_v29 = vshrl.u32 %v123_v28, 7  ;;  %s2795_s10 = sld [smem:[#allocation9_spill]]  ;;  %vm936_vm9 = vcmask 11264   ;;  %vm636_vm10 = vcmask 1040384   ;;  %vm646_vm11 = vcmask 1043458   ;;  %s2797_s4 = sld [smem:[#allocation16_spill]] }
  0x28   :  { %vm655_vm12 = vcmask 9216   ;;  %s2104_s3 = smov 96   ;;  %vm1508_vm13 = vcmask 254976   ;;  %s2106_s1 = smov [#allocation4]  }
  0x29   :  { %v125_v30 = vsub.s32 0, %v124_v29  ;;  %v133_v31 = vsub.s32 2, %v124_v29  ;;  %v129_v47 = vsub.s32 1, %v124_v29  ;;  %v137_v48 = vsub.s32 3, %v124_v29 }
  0x2b   :  { %v121_v32 = vld [vmem:[%s2792_s27] sm:$0xf]  ;;  %v1927_v0 = vld [vmem:[%s2793_s8 + $0x4] ss:$8 sps:$4 sm:$0xff]   ;;  %v1933_v3 = vld [vmem:[%s2793_s8 + $0x14] ss:$8 sps:$4 sm:$0xff]  }
  0x2c   :  { %v126_v33 = vrot.slane %v121_v32, %v125_v30  ;;  %v134_v34 = vrot.slane %v121_v32, %v133_v31  ;;  %v130_v49 = vrot.slane %v121_v32, %v129_v47  ;;  %v138_v50 = vrot.slane %v121_v32, %v137_v48  ;;  %v1925_v63 = vld [vmem:[%s2793_s8] ss:$8 sps:$4 sm:$0xff]   ;;  %v1930_v2 = vld [vmem:[%s2794_s30 + $0x4] ss:$8 sps:$4 sm:$0xff]   ;;  %384 = vmatprep.subr.bf16.mxu0 %v1927_v0  ;;  %v1936_v4 = vld [vmem:[%s2794_s30 + $0x14] ss:$8 sps:$4 sm:$0xff]  }
  0x2d   :  { %v1928_v1 = vld [vmem:[%s2794_s30] ss:$8 sps:$4 sm:$0xff]   ;;  %385 = vmatpush1.bf16.msra.mxu0 %v1925_v63  ;;  %536 = vmatprep.subr.bf16.mxu1 %v1930_v2  ;;  %v1931_v5 = vld [vmem:[%s2793_s8 + $0x10] ss:$8 sps:$4 sm:$0xff]   ;;  %v1939_v7 = vld [vmem:[%s2793_s8 + $0x24] ss:$8 sps:$4 sm:$0xff]  }
  0x2e   :  { %537 = vmatpush1.bf16.msra.mxu1 %v1928_v1  ;;  %386 = vmatprep.subr.bf16.mxu0 %v1933_v3  ;;  %v1934_v6 = vld [vmem:[%s2794_s30 + $0x10] ss:$8 sps:$4 sm:$0xff]   ;;  %v1942_v9 = vld [vmem:[%s2794_s30 + $0x24] ss:$8 sps:$4 sm:$0xff]   ;;  %v1937_v11 = vld [vmem:[%s2793_s8 + $0x20] ss:$8 sps:$4 sm:$0xff]  }
  0x2f   :  { %538 = vmatprep.subr.bf16.mxu1 %v1936_v4  ;;  %v1940_v12 = vld [vmem:[%s2794_s30 + $0x20] ss:$8 sps:$4 sm:$0xff]   ;;  %v1945_v13 = vld [vmem:[%s2793_s8 + $0x34] ss:$8 sps:$4 sm:$0xff]   ;;  %v1943_v15 = vld [vmem:[%s2793_s8 + $0x30] ss:$8 sps:$4 sm:$0xff]  }
  0x30   :  { %v1948_v14 = vld [vmem:[%s2794_s30 + $0x34] ss:$8 sps:$4 sm:$0xff]   ;;  %v1946_v16 = vld [vmem:[%s2794_s30 + $0x30] ss:$8 sps:$4 sm:$0xff]   ;;  %s2796_s8 = sld [smem:[#allocation18_spill]] }
  0x31   :  { %387 = vmatpush1.bf16.msra.mxu0 %v1931_v5  ;;  %v1951_v63 = vld [vmem:[%s2755_s11 + $0x10] sm:$0xff]   ;;  %v1952_v1 = vld [vmem:[%s2755_s11 + $0x18] sm:$0xff]   ;;  %s2798_s27 = sld [smem:[#allocation10_spill]] }
  0x32   :  { %539 = vmatpush1.bf16.msra.mxu1 %v1934_v6  ;;  %388 = vmatprep.subr.bf16.mxu0 %v1939_v7 }
  0x33   :  { %540 = vmatprep.subr.bf16.mxu1 %v1942_v9 }
  0x35   :  { %389 = vmatpush1.bf16.msra.mxu0 %v1937_v11 }
  0x36   :  { %541 = vmatpush1.bf16.msra.mxu1 %v1940_v12  ;;  %390 = vmatprep.subr.bf16.mxu0 %v1945_v13 }
  0x37   :  { %542 = vmatprep.subr.bf16.mxu1 %v1948_v14  ;;  %v1685_v14 = vld [vmem:[%s2756_s12] ss:$0 sm:$0xff] }
  0x39   :  { %391 = vmatpush1.bf16.msra.mxu0 %v1943_v15 }
  0x3a   :  { %543 = vmatpush1.bf16.msra.mxu1 %v1946_v16  ;;  %1777 = vmatprep.subr.bf16.mxu0 %v2101_v23  ;;  %v1691_v16 = vld [vmem:[%s2796_s8] ss:$0 sm:$0xff]  ;;  %s2800_s8 = sld [smem:[#allocation17_spill]] }
  0x3b   :  { %1797 = vmatprep.subr.bf16.mxu1 %v2101_v23 }
  0xf6   :  { %v261_v35 = vpop.f32.mrb[0].mxu0  ;;  %v302_v36 = vpop.f32.mrb[0].mxu1 }
  0xf7   :  { %v2310_v37 = vadd.f32 %v261_v35, %v126_v33  ;;  %v2312_v38 = vadd.f32 %v302_v36, %v134_v34  ;;  %v304_v39 = vpop.f32.mrb[1].mxu1  ;;  %v263_v40 = vpop.f32.mrb[1].mxu0  ;;  %v811_v33 = vld [vmem:[%s2795_s10 + $0x9] sm:$0x1]  ;;  %v812_v34 = vld [vmem:[%s2795_s10 + $0x3] sm:$0x1] }
  0xf8   :  { %v306_v41 = vpop.f32.mrb[2].mxu1  ;;  %v265_v42 = vpop.f32.mrb[2].mxu0  ;;  %v2316_v51 = vadd.f32 %v263_v40, %v130_v49  ;;  %v2318_v52 = vadd.f32 %v304_v39, %v138_v50  ;;  %v813_v35 = vld [vmem:[%s2795_s10 + $0xb] sm:$0x1]  ;;  %v796_v36 = vld [vmem:[%s2795_s10 + $0x2] sm:$0x1] }
  0xf9   :  { %v1650_v43 = vmul.f32 -1.442695, %v2310_v37  ;;  %v1663_v44 = vmul.f32 -1.442695, %v2312_v38  ;;  %v307_v45 = vpop.f32.mrb[3].mxu1  ;;  %v266_v46 = vpop.f32.mrb[3].mxu0 }
  0xfa   :  { %v1651_v17 = vmul.f32 -1.442695, %v2316_v51  ;;  %v1664_v18 = vmul.f32 -1.442695, %v2318_v52  ;;  %v816_v39 = vrot.slane %v811_v33, 7  ;;  %v821_v40 = vrot.slane %v812_v34, 6 }
  0xfb   :  { %1989 = vpow2.f32 %v1650_v43  ;;  %v822_v41 = vrot.slane %v813_v35, 5  ;;  %v797_v42 = vld [vmem:[%s2795_s10 + $0xa] sm:$0x1]  ;;  %v810_v43 = vld [vmem:[%s2795_s10 + $0x1] sm:$0x1]  ;;  %v805_v47 = vrot.slane %v796_v36, 6 }
  0xfc   :  { %1991 = vpow2.f32 %v1663_v44  ;;  %v795_v45 = vld [vmem:[%s2795_s10 + $0x8] sm:$0x1]  ;;  %v1949_v46 = vld [vmem:[%s2755_s11] sm:$0xff]   ;;  %v806_v48 = vrot.slane %v797_v42, 5  ;;  %v817_v49 = vsel %vm92_vm0, %v816_v39, %v810_v43 }
  0xfd   :  { %1993 = vtanh.f32 %v2316_v51  ;;  %v823_v50 = vsel %vm99_vm1, %v822_v41, %v821_v40 }
  0xfe   :  { %1995 = vtanh.f32 %v2318_v52 }
 0x105   :  { %v1990_v53 = vpop.eup %1989 }
 0x106   :  { %v1992_v54 = vpop.eup %1991  ;;  %v312_v55 = vadd.f32 1.0, %v1990_v53 }
 0x107   :  { %v463_v56 = vadd.f32 1.0, %v1992_v54  ;;  %v1994_v57 = vpop.eup %1993  ;;  %v800_v54 = vrot.slane %v795_v45, 7 }
 0x108   :  { %1997 = vrcp.f32 %v312_v55  ;;  %v1996_v58 = vpop.eup %1995  ;;  %v794_v55 = vld [vmem:[%s2795_s10] sm:$0x1] }
 0x109   :  { %1999 = vrcp.f32 %v463_v56  ;;  %v1950_v56 = vld [vmem:[%s2755_s11 + $0x8] sm:$0xff]  }
 0x112   :  { %v1998_v59 = vpop.eup %1997 }
 0x113   :  { %v2000_v60 = vpop.eup %1999  ;;  %v2322_v61 = vmul.f32 %v1998_v59, %v1994_v57  ;;  %v825_v57 = vsel %vm102_vm2, %v817_v49, %v823_v50  ;;  %v801_v59 = vsel %vm92_vm0, %v800_v54, %v794_v55 }
 0x114   :  { %v2324_v62 = vmul.f32 %v2000_v60, %v1996_v58  ;;  %v807_v58 = vsel %vm99_vm1, %v806_v48, %v805_v47  ;;  %v827_v60 = vrot.slane %v825_v57, 4 }
 0x115   :  { %2001 = vtanh.f32 %v2322_v61  ;;  %v809_v0 = vsel %vm102_vm2, %v801_v59, %v807_v58 }
 0x116   :  { %2003 = vtanh.f32 %v2324_v62  ;;  %v830_v2 = vsel %vm829_vm5, %v809_v0, %v827_v60 }
 0x117   :  { %2005 = vpow2.f32 %v1651_v17  ;;  %v831_v3 = vpack.c.bf16 %v830_v2, %v830_v2 }
 0x118   :  { %2007 = vpow2.f32 %v1664_v18 }
 0x11f   :  { %v2002_v8 = vpop.eup %2001 }
 0x120   :  { %v2004_v10 = vpop.eup %2003  ;;  %325 = vrot.lane.b32.xlu1 %v2002_v8, %s2100_s5 }
 0x121   :  { %476 = vrot.lane.b32.xlu0 %v2004_v10, %s2100_s5  ;;  %v2006_v19 = vpop.eup %2005 }
 0x122   :  { %v2008_v20 = vpop.eup %2007  ;;  %v319_v21 = vadd.f32 1.0, %v2006_v19 }
 0x123   :  { %v470_v22 = vadd.f32 1.0, %v2008_v20 }
 0x124   :  { %2009 = vrcp.f32 %v319_v21 }
 0x125   :  { %2011 = vrcp.f32 %v470_v22 }
 0x12e   :  { %v2010_v24 = vpop.eup %2009 }
 0x12f   :  { %v2012_v26 = vpop.eup %2011 }
 0x192   :  { %v326_v25 = vpop.permute.xlu1 %325 }
 0x193   :  { %v477_v27 = vpop.permute.xlu0 %476  ;;  %v2382_v28 = vmul.f32 %v2010_v24, %v326_v25 }
 0x194   :  { %v2384_v29 = vmul.f32 %v2012_v26, %v477_v27  ;;  %v447_v27 = vrot.slane %v2322_v61, 6 }
 0x195   :  { %v329_v30 = vpack.c.bf16 %v2382_v28, %v2382_v28 }
 0x196   :  { %v480_v31 = vpack.c.bf16 %v2384_v29, %v2384_v29 }
 0x197   :  { %339 = vrot.lane.b32.xlu1 %v329_v30, %s2100_s5  ;;  %v593_v30 = vrot.slane %v2324_v62, 2 }
 0x198   :  { %v490_v32 = vrot.slane %v480_v31, 1 }
 0x19a   :  { %491 = vrot.lane.b32.xlu0 %v490_v32, %s2100_s5 }
 0x209   :  { %v340_v44 = vpop.permute.xlu1 %339 }
 0x20a   :  { %1660 = vmatmul.mubr.msk.bf16.vlgmr.msra.gmra.mrb[4].mxu0 %vm223_vm3, %v340_v44 }
 0x20b   :  { %1793 = vmatprep.mubr.msk.bf16.mxu0 %vm2102_vm4, %v2101_v23 }
 0x20c   :  { %v492_v53 = vpop.permute.xlu0 %491 }
 0x20d   :  { %1673 = vmatmul.mubr.msk.bf16.vlgmr.msra.gmra.mrb[4].mxu1 %vm223_vm3, %v492_v53 }
 0x20e   :  { %1798 = vmatpush3.bf16.msra.mxu1 %v1949_v46  ;;  %1805 = vmatprep.mubr.msk.bf16.mxu1 %vm2102_vm4, %v2101_v23 }
 0x20f   :  { %1799 = vmatprep.subr.bf16.mxu1 %v2101_v23 }
 0x212   :  { %1800 = vmatpush3.bf16.msra.mxu1 %v1950_v56 }
 0x213   :  { %1801 = vmatprep.subr.bf16.mxu1 %v2101_v23 }
 0x216   :  { %1802 = vmatpush3.bf16.msra.mxu1 %v1951_v63 }
 0x217   :  { %1803 = vmatprep.subr.bf16.mxu1 %v2101_v23 }
 0x21a   :  { %1804 = vmatpush3.bf16.msra.mxu1 %v1952_v1 }
 0x21b   :  { %1809 = vmatprep.subr.bf16.mxu1 %v2101_v23 }
 0x21d   :  { %1806 = vmatmul.mubr.msk.bf16.vlgmr.msra.gmra.mrb[8].mxu1 %vm223_vm3, %v831_v3 }
 0x21e   :  { %1817 = vmatprep.mubr.msk.bf16.mxu1 %vm2102_vm4, %v2101_v23 }
 0x2dd   :  { %v418_v4 = vpop.f32.mrb[4].mxu0 }
 0x2de   :  { %v420_v5 = vpop.f32.mrb[5].mxu0  ;;  %v427_v41 = vrot.slane %v418_v4, 6 }
 0x2df   :  { %v422_v6 = vpop.f32.mrb[6].mxu0  ;;  %v428_v49 = vrot.slane %v420_v5, 6 }
 0x2e0   :  { %v570_v7 = vpop.f32.mrb[4].mxu1  ;;  %v423_v8 = vpop.f32.mrb[7].mxu0  ;;  %v431_v62 = vadd.f32 %v427_v41, %v2310_v37  ;;  %v2103_v37 = vmov 1   ;;  %v1954_v41 = vld [vmem:[%s2757_s13 + $0x8] sm:$0xff]  }
 0x2e1   :  { %v572_v9 = vpop.f32.mrb[5].mxu1  ;;  %v577_v12 = vadd.f32 %v570_v7, %v2312_v38  ;;  %v432_v53 = vadd.f32 %v428_v49, %v2316_v51  ;;  %1899 = vset.pattern.permute.xlu0 %v2103_v37 }
 0x2e2   :  { %v574_v10 = vpop.f32.mrb[6].mxu1  ;;  %v2459_v26 = vadd.f32 %v572_v9, %v2318_v52  ;;  %v1661_v44 = vmul.f32 -1.442695, %v431_v62  ;;  %v1955_v62 = vld [vmem:[%s2757_s13 + $0x10] sm:$0xff]  }
 0x2e3   :  { %v575_v11 = vpop.f32.mrb[7].mxu1  ;;  %v1674_v13 = vmul.f32 -1.442695, %v577_v12  ;;  %v1662_v57 = vmul.f32 -1.442695, %v432_v53 }
 0x2e5   :  { %2013 = vpow2.f32 %v1674_v13 }
 0x2ef   :  { %v2014_v24 = vpop.eup %2013 }
 0x2f0   :  { %v908_v15 = vpop.f32.mrb[8].mxu1  ;;  %v582_v25 = vadd.f32 1.0, %v2014_v24 }
 0x2f1   :  { %v2454_v17 = vadd.f32 %v1685_v14, %v908_v15  ;;  %v1807_v18 = vpop.f32.mrb[9].mxu1  ;;  %v1675_v14 = vmul.f32 -1.442695, %v2459_v26 }
 0x2f2   :  { %v911_v19 = vpop.f32.mrb[10].mxu1  ;;  %2015 = vrcp.f32 %v582_v25 }
 0x2f3   :  { %v1808_v20 = vpop.f32.mrb[11].mxu1  ;;  %v921_v38 = vmul.f32 %v1691_v16, %v2454_v17  ;;  %2017 = vtanh.f32 %v2459_v26  ;;  %v959_v8 = vrot.slane %v2454_v17, 4 }
 0x2f5   :  { %v928_v21 = vsel %vm927_vm6, %v921_v38, 0.0  ;;  %v923_v22 = vsel %vm922_vm7, %v921_v38, 0.0 }
 0x2f6   :  { %929 = vadd.xlane.f32.xlu0 %v928_v21  ;;  %924 = vadd.xlane.f32.xlu1 %v923_v22 }
 0x2fc   :  { %v2016_v31 = vpop.eup %2015 }
 0x2fd   :  { %v2018_v32 = vpop.eup %2017 }
 0x2fe   :  { %v598_v33 = vmul.f32 %v2018_v32, %v2016_v31 }
 0x307   :  { %448 = vrot.lane.b32.xlu1 %v447_v27, %s2100_s5 }
 0x30b   :  { %594 = vrot.lane.b32.xlu1 %v593_v30, %s2100_s5 }
 0x30f   :  { %600 = vrot.lane.b32.xlu1 %v598_v33, %s2100_s5 }
 0x383   :  { %v930_v34 = vpop.xlane.xlu0 %929  ;;  %v925_v35 = vpop.xlane.xlu1 %924 }
 0x384   :  { %v931_v52 = vmul.f32 0.125, %v930_v34  ;;  %v926_v39 = vmul.f32 0.125, %v925_v35 }
 0x386   :  { %v933_v36 = vrot.slane %v931_v52, 4 }
 0x387   :  { %v449_v58 = vpop.permute.xlu1 %448 }
 0x388   :  { %v935_v61 = vsel %vm653_vm8, %v926_v39, %v933_v36 }
 0x389   :  { %v937_v40 = vsel %vm936_vm9, %v935_v61, -inf }
 0x38a   :  { %938 = vmax.xlane.f32.xlu0 %v937_v40  ;;  %v1953_v40 = vld [vmem:[%s2757_s13] sm:$0xff]  }
 0x38b   :  { %v595_v60 = vpop.permute.xlu1 %594  ;;  %1810 = vmatpush3.bf16.msra.mxu1 %v1953_v40 }
 0x38c   :  { %v597_v4 = vmul.f32 %v2016_v31, %v595_v60  ;;  %1811 = vmatprep.subr.bf16.mxu1 %v2101_v23  ;;  %v1958_v60 = vld [vmem:[%s2797_s4 + $0x8] sm:$0xff]  }
 0x38f   :  { %v601_v3 = vpop.permute.xlu1 %600  ;;  %1812 = vmatpush3.bf16.msra.mxu1 %v1954_v41 }
 0x390   :  { %v603_v5 = vadd.f32 %v601_v3, %v597_v4  ;;  %1813 = vmatprep.subr.bf16.mxu1 %v2101_v23 }
 0x392   :  { %v627_v15 = vrot.slane %v603_v5, 1 }
 0x393   :  { %1814 = vmatpush3.bf16.msra.mxu1 %v1955_v62 }
 0x394   :  { %1815 = vmatprep.subr.bf16.mxu1 %v2101_v23 }
 0x417   :  { %v939_v42 = vpop.xlane.xlu0 %938 }
 0x418   :  { %v940_v43 = vsub.f32 %v935_v61, %v939_v42  ;;  %v1956_v42 = vld [vmem:[%s2757_s13 + $0x18] sm:$0xff]  }
 0x419   :  { %1816 = vmatpush3.bf16.msra.mxu1 %v1956_v42 }
 0x41a   :  { %v941_v45 = vmul.f32 1.442695, %v940_v43  ;;  %1833 = vmatprep.subr.bf16.mxu1 %v2101_v23 }
 0x41c   :  { %2019 = vpow2.f32 %v941_v45 }
 0x41d   :  { %2021 = vpow2.f32 %v1661_v44 }
 0x426   :  { %v2020_v46 = vpop.eup %2019 }
 0x427   :  { %v943_v47 = vsel %vm936_vm9, %v2020_v46, 0.0  ;;  %v2022_v48 = vpop.eup %2021 }
 0x428   :  { %944 = vadd.xlane.f32.xlu0 %v943_v47  ;;  %v436_v50 = vadd.f32 1.0, %v2022_v48 }
 0x42a   :  { %2023 = vrcp.f32 %v436_v50 }
 0x42b   :  { %2025 = vtanh.f32 %v432_v53 }
 0x42c   :  { %2027 = vpow2.f32 %v1662_v57 }
 0x434   :  { %v2024_v54 = vpop.eup %2023 }
 0x435   :  { %v2026_v55 = vpop.eup %2025  ;;  %v451_v1 = vmul.f32 %v2024_v54, %v449_v58 }
 0x436   :  { %v452_v56 = vmul.f32 %v2026_v55, %v2024_v54  ;;  %v2028_v59 = vpop.eup %2027 }
 0x437   :  { %v443_v0 = vadd.f32 1.0, %v2028_v59  ;;  %v1957_v59 = vld [vmem:[%s2797_s4] sm:$0xff]  }
 0x438   :  { %1778 = vmatpush3.bf16.msra.mxu0 %v1957_v59  ;;  %v1983_v59 = vld [vmem:[%s2765_s21 + $0x28] sm:$0xff]  }
 0x439   :  { %1779 = vmatprep.subr.bf16.mxu0 %v2101_v23 }
 0x43c   :  { %1780 = vmatpush3.bf16.msra.mxu0 %v1958_v60  ;;  %v1984_v60 = vld [vmem:[%s2767_s23 + $0x28] sm:$0xff]  }
 0x43d   :  { %1781 = vmatprep.subr.bf16.mxu0 %v2101_v23 }
 0x43e   :  { %454 = vrot.lane.b32.xlu0 %v452_v56, %s2100_s5 }
 0x4b5   :  { %v945_v63 = vpop.xlane.xlu0 %944 }
 0x4b6   :  { %2029 = vrcp.f32 %v945_v63  ;;  %v1959_v63 = vld [vmem:[%s2797_s4 + $0x10] sm:$0xff]  }
 0x4b7   :  { %2031 = vrcp.f32 %v443_v0  ;;  %1782 = vmatpush3.bf16.msra.mxu0 %v1959_v63  ;;  %v1960_v0 = vld [vmem:[%s2797_s4 + $0x18] sm:$0xff]   ;;  %v1985_v63 = vld [vmem:[%s2765_s21 + $0x30] sm:$0xff]  }
 0x4b8   :  { %1783 = vmatprep.subr.bf16.mxu0 %v2101_v23 }
 0x4b9   :  { %v455_v2 = vpop.permute.xlu0 %454 }
 0x4ba   :  { %v457_v51 = vadd.f32 %v455_v2, %v451_v1  ;;  %v1961_v1 = vld [vmem:[%s2797_s4 + $0x20] sm:$0xff]   ;;  %v1962_v2 = vld [vmem:[%s2797_s4 + $0x28] sm:$0xff]  }
 0x4bb   :  { %1784 = vmatpush3.bf16.msra.mxu0 %v1960_v0  ;;  %v1986_v0 = vld [vmem:[%s2767_s23 + $0x30] sm:$0xff]  }
 0x4bc   :  { %2033 = vtanh.f32 %v457_v51  ;;  %617 = vrot.lane.b32.xlu1 %v457_v51, %s2100_s5  ;;  %v620_v16 = vrot.slane %v457_v51, 1  ;;  %1785 = vmatprep.subr.bf16.mxu0 %v2101_v23  ;;  %v1963_v51 = vld [vmem:[%s2797_s4 + $0x30] sm:$0xff]  }
 0x4bd   :  { %2035 = vpow2.f32 %v1675_v14 }
 0x4be   :  { %2037 = vtanh.f32 %v603_v5 }
 0x4bf   :  { %1786 = vmatpush3.bf16.msra.mxu0 %v1961_v1 }
 0x4c0   :  { %v2030_v6 = vpop.eup %2029  ;;  %624 = vrot.lane.b32.xlu1 %v603_v5, %s2100_s5  ;;  %1787 = vmatprep.subr.bf16.mxu0 %v2101_v23 }
 0x4c1   :  { %v947_v7 = vmul.f32 %v2030_v6, %v2020_v46  ;;  %v2032_v9 = vpop.eup %2031 }
 0x4c3   :  { %955 = vperm.xlu0 %1899, %v947_v7   ;;  %1788 = vmatpush3.bf16.msra.mxu0 %v1962_v2 }
 0x4c4   :  { %960 = vrot.lane.b32.xlu1 %v959_v8, %s2100_s5  ;;  %1789 = vmatprep.subr.bf16.mxu0 %v2101_v23 }
 0x4c6   :  { %v2034_v10 = vpop.eup %2033 }
 0x4c7   :  { %v459_v11 = vmul.f32 %v2034_v10, %v2032_v9  ;;  %v2036_v30 = vpop.eup %2035  ;;  %1790 = vmatpush3.bf16.msra.mxu0 %v1963_v51  ;;  %v1964_v10 = vld [vmem:[%s2797_s4 + $0x38] sm:$0xff]  }
 0x4c8   :  { %950 = vperm.xlu1 %1900, %v947_v7   ;;  %v589_v33 = vadd.f32 1.0, %v2036_v30  ;;  %v2038_v34 = vpop.eup %2037  ;;  %1791 = vmatprep.subr.bf16.mxu0 %v2101_v23  ;;  %v1972_v30 = vld [vmem:[%s2761_s17 + $0x18] sm:$0xff]  }
 0x4c9   :  { %612 = vrot.lane.b32.xlu0 %v459_v11, %s2100_s5  ;;  %v1969_v11 = vld [vmem:[%s2761_s17] sm:$0xff]  }
 0x4ca   :  { %2039 = vrcp.f32 %v589_v33 }
 0x4cb   :  { %1792 = vmatpush3.bf16.msra.mxu0 %v1964_v10 }
 0x4cc   :  { %1821 = vmatprep.subr.bf16.mxu0 %v2101_v23 }
 0x4cd   :  { %607 = vrot.lane.b32.xlu0 %v2382_v28, %s2100_s5 }
 0x4d4   :  { %v2040_v35 = vpop.eup %2039 }
 0x4d5   :  { %v605_v36 = vmul.f32 %v2040_v35, %v2038_v34 }
 0x52e   :  { %v618_v12 = vpop.permute.xlu1 %617 }
 0x52f   :  { %v622_v19 = vsel %vm223_vm3, %v618_v12, %v620_v16  ;;  %v1970_v12 = vld [vmem:[%s2761_s17 + $0x8] sm:$0xff]  }
 0x530   :  { %v631_v38 = vrot.slane %v622_v19, 2 }
 0x532   :  { %v625_v13 = vpop.permute.xlu1 %624 }
 0x533   :  { %v629_v18 = vsel %vm223_vm3, %v625_v13, %v627_v15 }
 0x534   :  { %v634_v20 = vrot.slane %v629_v18, 7 }
 0x536   :  { %v961_v21 = vpop.permute.xlu1 %960  ;;  %v637_v25 = vsel %vm636_vm10, %v631_v38, %v634_v20  ;;  %v1965_v20 = vld [vmem:[%s2759_s15] sm:$0xff]  }
 0x537   :  { %v643_v27 = vrot.slane %v637_v25, 6 }
 0x542   :  { %v956_v22 = vpop.permute.xlu0 %955 }
 0x543   :  { %v963_v24 = vmul.f32 %v961_v21, %v956_v22  ;;  %v1966_v21 = vld [vmem:[%s2759_s15 + $0x8] sm:$0xff]   ;;  %v1967_v22 = vld [vmem:[%s2759_s15 + $0x10] sm:$0xff]  }
 0x545   :  { %965 = vrot.lane.b32.xlu0 %v963_v24, %s2100_s5  ;;  %v1692_v24 = vld [vmem:[%s2758_s14] ss:$0 sm:$0xff] }
 0x546   :  { %v613_v28 = vpop.permute.xlu0 %612 }
 0x547   :  { %v2484_v26 = vsel %vm223_vm3, %v613_v28, %v2384_v29  ;;  %v951_v43 = vpop.permute.xlu1 %950 }
 0x548   :  { %v645_v31 = vmul.f32 %v643_v27, %v2484_v26  ;;  %v953_v44 = vmul.f32 %v951_v43, %v2454_v17  ;;  %v678_v13 = vrot.slane %v2484_v26, 2  ;;  %v1971_v26 = vld [vmem:[%s2761_s17 + $0x10] sm:$0xff]  }
 0x54a   :  { %v647_v32 = vsel %vm646_vm11, %v645_v31, 0.0  ;;  %v608_v52 = vpop.permute.xlu0 %607  ;;  %v1698_v31 = vld [vmem:[%s2760_s16] ss:$0 sm:$0xff] }
 0x54b   :  { %648 = vadd.xlane.f32.xlu1 %v647_v32  ;;  %v2488_v39 = vsel %vm223_vm3, %v608_v52, %v605_v36 }
 0x54c   :  { %v638_v61 = vmul.f32 %v637_v25, %v2488_v39  ;;  %v1968_v25 = vld [vmem:[%s2759_s15 + $0x18] sm:$0xff]   ;;  %s2799_s15 = sld [smem:[#allocation11_spill]] }
 0x54e   :  { %v639_v29 = vsel %vm102_vm2, %v638_v61, 0.0  ;;  %v1704_v61 = vld [vmem:[%s2762_s18] ss:$0 sm:$0xff] }
 0x564   :  { %640 = vadd.xlane.f32.xlu0 %v639_v29 }
 0x5b7   :  { %v966_v45 = vpop.permute.xlu0 %965 }
 0x5b8   :  { %v968_v46 = vadd.f32 %v966_v45, %v953_v44 }
 0x5ba   :  { %v969_v47 = vpack.c.bf16 %v968_v46, %v968_v46 }
 0x5bc   :  { %986 = vrot.lane.b32.xlu0 %v969_v47, %s2100_s5 }
 0x5d8   :  { %v649_v48 = vpop.xlane.xlu1 %648 }
 0x5d9   :  { %v651_v49 = vrot.slane %v649_v48, 2 }
 0x5f1   :  { %v641_v50 = vpop.xlane.xlu0 %640 }
 0x5f2   :  { %v654_v53 = vsel %vm653_vm8, %v641_v50, %v651_v49  ;;  %v1973_v49 = vld [vmem:[%s2765_s21] sm:$0xff]  }
 0x5f3   :  { %v656_v54 = vsel %vm655_vm12, %v654_v53, -inf  ;;  %v1974_v50 = vld [vmem:[%s2767_s23] sm:$0xff]  }
 0x5f4   :  { %657 = vmax.xlane.f32.xlu1 %v656_v54  ;;  %v1976_v54 = vld [vmem:[%s2767_s23 + $0x8] sm:$0xff]  }
 0x62e   :  { %v987_v55 = vpop.permute.xlu0 %986 }
 0x62f   :  { %1818 = vmatmul.mubr.msk.bf16.vlgmr.msra.gmra.mrb[12].mxu1 %vm223_vm3, %v987_v55  ;;  %v1977_v55 = vld [vmem:[%s2765_s21 + $0x10] sm:$0xff]  }
 0x630   :  { %1841 = vmatprep.mubr.msk.bf16.mxu1 %vm2102_vm4, %v2101_v23  ;;  %1834 = vmatpush3.bf16.msra.mxu1 %v1969_v11 }
 0x631   :  { %1835 = vmatprep.subr.bf16.mxu1 %v2101_v23 }
 0x634   :  { %1836 = vmatpush3.bf16.msra.mxu1 %v1970_v12  ;;  %v1483_v12 = vld [vmem:[%s2798_s27] sm:$0x1] }
 0x635   :  { %1837 = vmatprep.subr.bf16.mxu1 %v2101_v23 }
 0x638   :  { %1838 = vmatpush3.bf16.msra.mxu1 %v1971_v26 }
 0x639   :  { %1839 = vmatprep.subr.bf16.mxu1 %v2101_v23 }
 0x63c   :  { %1840 = vmatpush3.bf16.msra.mxu1 %v1972_v30  ;;  %v1676_v30 = vld [vmem:[%s2800_s8] ss:$0 sm:$0xff] }
 0x63d   :  { %1865 = vmatprep.subr.bf16.mxu1 %v2101_v23 }
 0x681   :  { %v658_v17 = vpop.xlane.xlu1 %657 }
 0x682   :  { %v659_v56 = vsub.f32 %v654_v53, %v658_v17  ;;  %v1975_v53 = vld [vmem:[%s2765_s21 + $0x8] sm:$0xff]   ;;  %v1978_v17 = vld [vmem:[%s2767_s23 + $0x10] sm:$0xff]  }
 0x684   :  { %v660_v37 = vmul.f32 1.442695, %v659_v56  ;;  %v1979_v56 = vld [vmem:[%s2765_s21 + $0x18] sm:$0xff]  }
 0x686   :  { %2041 = vpow2.f32 %v660_v37  ;;  %v1980_v37 = vld [vmem:[%s2767_s23 + $0x18] sm:$0xff]  }
 0x690   :  { %v2042_v57 = vpop.eup %2041 }
 0x691   :  { %v662_v58 = vsel %vm655_vm12, %v2042_v57, 0.0 }
 0x692   :  { %663 = vadd.xlane.f32.xlu1 %v662_v58  ;;  %v1982_v58 = vld [vmem:[%s2767_s23 + $0x20] sm:$0xff]  }
 0x702   :  { %v1049_v3 = vpop.f32.mrb[12].mxu1 }
 0x703   :  { %v1819_v4 = vpop.f32.mrb[13].mxu1  ;;  %v1050_v28 = vadd.f32 %v1692_v24, %v1049_v3  ;;  %v1987_v3 = vld [vmem:[%s2765_s21 + $0x38] sm:$0xff]  }
 0x704   :  { %v1052_v5 = vpop.f32.mrb[14].mxu1  ;;  %v1988_v4 = vld [vmem:[%s2767_s23 + $0x38] sm:$0xff]  }
 0x705   :  { %v1820_v6 = vpop.f32.mrb[15].mxu1  ;;  %v1055_v27 = vpack.c.bf16 %v1050_v28, %v1050_v28  ;;  %v1710_v5 = vld [vmem:[%s2763_s19] ss:$0 sm:$0xff] }
 0x71f   :  { %v664_v7 = vpop.xlane.xlu1 %663 }
 0x720   :  { %2043 = vrcp.f32 %v664_v7  ;;  %v1547_v7 = vld [vmem:[%s2799_s15 + $0x2] sm:$0x1] }
 0x72a   :  { %v2044_v8 = vpop.eup %2043 }
 0x72b   :  { %v666_v9 = vmul.f32 %v2044_v8, %v2042_v57  ;;  %v1981_v57 = vld [vmem:[%s2765_s21 + $0x20] sm:$0xff]  }
 0x72d   :  { %674 = vperm.xlu0 %1899, %v666_v9   ;;  %669 = vperm.xlu1 %1900, %v666_v9   ;;  %v1711_v9 = vld [vmem:[%s2764_s20] ss:$0 sm:$0xff] }
 0x7ac   :  { %v675_v14 = vpop.permute.xlu0 %674  ;;  %v670_v15 = vpop.permute.xlu1 %669 }
 0x7ad   :  { %v680_v16 = vmul.f32 %v678_v13, %v675_v14  ;;  %v672_v18 = vmul.f32 %v670_v15, %v2488_v39  ;;  %v1546_v14 = vld [vmem:[%s2799_s15] sm:$0x1]  ;;  %v1513_v15 = vld [vmem:[%s2798_s27 + $0x3] sm:$0x1] }
 0x7af   :  { %v681_v19 = vadd.f32 %v680_v16, %v672_v18  ;;  %v1571_v16 = vld [vmem:[%s2799_s15 + $0x3] sm:$0x1]  ;;  %v1512_v18 = vld [vmem:[%s2798_s27 + $0x1] sm:$0x1] }
 0x7b1   :  { %v682_v38 = vpack.c.bf16 %v681_v19, %v681_v19  ;;  %v1570_v19 = vld [vmem:[%s2799_s15 + $0x1] sm:$0x1] }
 0x7b3   :  { %1794 = vmatmul.mubr.bf16.vlgmr.msra.gmra.mrb[8].mxu0 %v682_v38 }
 0x7b4   :  { %1822 = vmatpush3.bf16.msra.mxu0 %v1965_v20  ;;  %1829 = vmatprep.mubr.msk.bf16.mxu0 %vm2102_vm4, %v2101_v23 }
 0x7b5   :  { %1823 = vmatprep.subr.bf16.mxu0 %v2101_v23 }
 0x7b8   :  { %1824 = vmatpush3.bf16.msra.mxu0 %v1966_v21 }
 0x7b9   :  { %1825 = vmatprep.subr.bf16.mxu0 %v2101_v23 }
 0x7bc   :  { %1826 = vmatpush3.bf16.msra.mxu0 %v1967_v22 }
 0x7bd   :  { %1827 = vmatprep.subr.bf16.mxu0 %v2101_v23 }
 0x7c0   :  { %1828 = vmatpush3.bf16.msra.mxu0 %v1968_v25 }
 0x7c1   :  { %1845 = vmatprep.subr.bf16.mxu0 %v2101_v23 }
 0x7c3   :  { %1830 = vmatmul.mubr.msk.bf16.vlgmr.msra.gmra.mrb[12].mxu0 %vm223_vm3, %v1055_v27 }
 0x7c4   :  { %1861 = vmatprep.mubr.msk.bf16.mxu0 %vm2102_vm4, %v2101_v23  ;;  %1846 = vmatpush3.bf16.msra.mxu0 %v1973_v49 }
 0x7c5   :  { %1847 = vmatprep.subr.bf16.mxu0 %v2101_v23 }
 0x7c8   :  { %1848 = vmatpush3.bf16.msra.mxu0 %v1975_v53 }
 0x7c9   :  { %1849 = vmatprep.subr.bf16.mxu0 %v2101_v23 }
 0x7cc   :  { %1850 = vmatpush3.bf16.msra.mxu0 %v1977_v55 }
 0x7cd   :  { %1851 = vmatprep.subr.bf16.mxu0 %v2101_v23 }
 0x7d0   :  { %1852 = vmatpush3.bf16.msra.mxu0 %v1979_v56 }
 0x7d1   :  { %1853 = vmatprep.subr.bf16.mxu0 %v2101_v23 }
 0x7d4   :  { %1854 = vmatpush3.bf16.msra.mxu0 %v1981_v57 }
 0x7d5   :  { %1855 = vmatprep.subr.bf16.mxu0 %v2101_v23 }
 0x7d8   :  { %1856 = vmatpush3.bf16.msra.mxu0 %v1983_v59 }
 0x7d9   :  { %1857 = vmatprep.subr.bf16.mxu0 %v2101_v23 }
 0x7dc   :  { %1858 = vmatpush3.bf16.msra.mxu0 %v1985_v63 }
 0x7dd   :  { %1859 = vmatprep.subr.bf16.mxu0 %v2101_v23 }
 0x7e0   :  { %1860 = vmatpush3.bf16.msra.mxu0 %v1987_v3 }
 0x896   :  { %v1132_v32 = vpop.f32.mrb[12].mxu0 }
 0x897   :  { %v1133_v33 = vadd.f32 %v1698_v31, %v1132_v32  ;;  %v1831_v34 = vpop.f32.mrb[13].mxu0  ;;  %v1712_v31 = vld [vmem:[%s2766_s22] ss:$0 sm:$0xff]  ;;  %s2105_s22 = smov [#allocation2]  }
 0x898   :  { %v1135_v35 = vpop.f32.mrb[14].mxu0  ;;  %v1885_v32 = vadd.f32 %v1712_v31, %v1676_v30 }
 0x899   :  { %v1138_v52 = vmax.f32 %v1133_v33, 0.0  ;;  %v1832_v36 = vpop.f32.mrb[15].mxu0  ;;  %v1721_v33 = vld [vmem:[%s2768_s24] ss:$0 sm:$0xff]  ;;  %s1610_s24 = sshll.u32 %s2105_s22, 4  ;;  %s1611_s24 = int_to_ptr.vmem [resolvable:$true] %s1610_s24 }
 0x89a   :  { %p2056_p1 = scmp.lt.s32.totalorder %s1611_s24, %s1611_s24 }
 0x89b   :  { %v1139_v39 = vpack.c.bf16 %v1138_v52, %v1138_v52 }
 0x89d   :  { %1842 = vmatmul.mubr.msk.bf16.vlgmr.msra.gmra.mrb[16].mxu1 %vm223_vm3, %v1139_v39 }
 0x89e   :  { %1881 = vmatprep.mubr.msk.bf16.mxu1 %vm2102_vm4, %v2101_v23  ;;  %1866 = vmatpush3.bf16.msra.mxu1 %v1974_v50 }
 0x89f   :  { %1867 = vmatprep.subr.bf16.mxu1 %v2101_v23 }
 0x8a2   :  { %1868 = vmatpush3.bf16.msra.mxu1 %v1976_v54 }
 0x8a3   :  { %1869 = vmatprep.subr.bf16.mxu1 %v2101_v23 }
 0x8a6   :  { %1870 = vmatpush3.bf16.msra.mxu1 %v1978_v17 }
 0x8a7   :  { %1871 = vmatprep.subr.bf16.mxu1 %v2101_v23 }
 0x8aa   :  { %1872 = vmatpush3.bf16.msra.mxu1 %v1980_v37 }
 0x8ab   :  { %1873 = vmatprep.subr.bf16.mxu1 %v2101_v23 }
 0x8ae   :  { %1874 = vmatpush3.bf16.msra.mxu1 %v1982_v58 }
 0x8af   :  { %1875 = vmatprep.subr.bf16.mxu1 %v2101_v23 }
 0x8b2   :  { %1876 = vmatpush3.bf16.msra.mxu1 %v1984_v60 }
 0x8b3   :  { %1877 = vmatprep.subr.bf16.mxu1 %v2101_v23 }
 0x8b6   :  { %1878 = vmatpush3.bf16.msra.mxu1 %v1986_v0 }
 0x8b7   :  { %1879 = vmatprep.subr.bf16.mxu1 %v2101_v23  ;;  %v2669_v23 = vld [vmem:[%s2798_s27 + $0x2] sm:$0x1]  ;;  %s1620_s27 = sshll.u32 %s2106_s1, 4  ;;  %s1621_s27 = int_to_ptr.vmem [resolvable:$true] %s1620_s27 }
 0x8ba   :  { %1880 = vmatpush3.bf16.msra.mxu1 %v1988_v4 }
 0x970   :  { %v1216_v29 = vpop.f32.mrb[16].mxu1 }
 0x971   :  { %v1217_v40 = vadd.f32 %v1704_v61, %v1216_v29  ;;  %v1843_v41 = vpop.f32.mrb[17].mxu1 }
 0x972   :  { %v1219_v62 = vpop.f32.mrb[18].mxu1 }
 0x973   :  { %v1844_v42 = vpop.f32.mrb[19].mxu1  ;;  %v1222_v43 = vsel %vm922_vm7, %v1217_v40, 0.0 }
 0x974   :  { %1223 = vadd.xlane.f32.xlu0 %v1222_v43 }
 0xa01   :  { %v1224_v44 = vpop.xlane.xlu0 %1223 }
 0xa02   :  { %v1226_v45 = vmul.f32 0.015625, %v1224_v44 }
 0xa04   :  { %v1227_v46 = vsub.f32 %v1217_v40, %v1226_v45 }
 0xa06   :  { %v1228_v47 = vmul.f32 %v1227_v46, %v1227_v46  ;;  %v1240_v6 = vmul.f32 %v1710_v5, %v1227_v46 }
 0xa08   :  { %v1229_v48 = vsel %vm922_vm7, %v1228_v47, 0.0 }
 0xa09   :  { %1230 = vadd.xlane.f32.xlu1 %v1229_v48 }
 0xa1a   :  { %1489 = vrot.lane.b32.xlu1 %v2669_v23, %s2104_s3 }
 0xa1e   :  { %1552 = vrot.lane.b32.xlu1 %v1547_v7, %s2104_s3 }
 0xa22   :  { %1487 = vrot.lane.b32.xlu1 %v1483_v12, %s2104_s3 }
 0xa26   :  { %1550 = vrot.lane.b32.xlu1 %v1546_v14, %s2104_s3 }
 0xa96   :  { %v1231_v1 = vpop.xlane.xlu1 %1230 }
 0xa97   :  { %v1232_v2 = vmul.f32 0.015625, %v1231_v1 }
 0xa99   :  { %v1241_v51 = vadd.f32 1e-05, %v1232_v2 }
 0xa9a   :  { %v1490_v24 = vpop.permute.xlu1 %1489 }
 0xa9b   :  { %2045 = vrsqrt.f32 %v1241_v51  ;;  %v1494_v50 = vsub.f32 %v2669_v23, %v1490_v24 }
 0xa9e   :  { %v1553_v28 = vpop.permute.xlu1 %1552 }
 0xa9f   :  { %v1557_v54 = vsub.f32 %v1547_v7, %v1553_v28 }
 0xaa2   :  { %v1488_v26 = vpop.permute.xlu1 %1487 }
 0xaa3   :  { %v1493_v46 = vsub.f32 %v1483_v12, %v1488_v26 }
 0xaa5   :  { %v2046_v8 = vpop.eup %2045 }
 0xaa6   :  { %v1243_v10 = vmul.f32 %v2046_v8, %v1240_v6  ;;  %v1551_v35 = vpop.permute.xlu1 %1550 }
 0xaa7   :  { %v1556_v48 = vsub.f32 %v1546_v14, %v1551_v35 }
 0xaa8   :  { %v1251_v11 = vadd.f32 %v1711_v9, %v1243_v10 }
 0xaaa   :  { %v1253_v13 = vrot.slane %v1251_v11, 2 }
 0xaac   :  { %1254 = vrot.lane.b32.xlu0 %v1253_v13, %s2100_s5 }
 0xab0   :  { %1518 = vrot.lane.b32.xlu0 %v1513_v15, %s2104_s3 }
 0xab4   :  { %1576 = vrot.lane.b32.xlu0 %v1571_v16, %s2104_s3 }
 0xab8   :  { %1516 = vrot.lane.b32.xlu0 %v1512_v18, %s2104_s3 }
 0xabc   :  { %1574 = vrot.lane.b32.xlu0 %v1570_v19, %s2104_s3  ;;  %s2051_s3 = scalar_lea.vmem %s1611_s24, 32 }
 0xabd   :  { %p2052_p0 = scmp.ne.s32.totalorder %s1611_s24, %s2051_s3  ;;  %p2057_p2 = scmp.lt.s32.totalorder %s2051_s3, %s2051_s3 }
 0xabf   :  { %p2058_p3 = por %p2057_p2, %p2056_p1 }
 0xac1   :  { %p2059_p4 = pnand %p2058_p3, %p2052_p0 }
 0xb1e   :  { %v1255_v20 = vpop.permute.xlu0 %1254 }
 0xb1f   :  { %v1257_v38 = vsel %vm223_vm3, %v1251_v11, %v1255_v20 }
 0xb20   :  { %v1258_v21 = vpack.c.bf16 %v1257_v38, %v1257_v38 }
 0xb22   :  { %1862 = vmatmul.mubr.bf16.vlgmr.msra.gmra.mrb[8].mxu0 %v1258_v21  ;;  %1882 = vmatmul.mubr.bf16.vlgmr.msra.gmra.mrb[20].mxu1 %v1258_v21  ;;  %v1519_v22 = vpop.permute.xlu0 %1518 }
 0xb23   :  { %v1523_v47 = vsub.f32 %v1513_v15, %v1519_v22 }
 0xb26   :  { %v1577_v25 = vpop.permute.xlu0 %1576 }
 0xb27   :  { %v1581_v53 = vsub.f32 %v1571_v16, %v1577_v25 }
 0xb2a   :  { %v1517_v27 = vpop.permute.xlu0 %1516 }
 0xb2b   :  { %v1522_v42 = vsub.f32 %v1512_v18, %v1517_v27 }
 0xb2e   :  { %v1575_v34 = vpop.permute.xlu0 %1574 }
 0xb2f   :  { %v1580_v55 = vsub.f32 %v1570_v19, %v1575_v34 }
 0xbf5   :  { %v1364_v52 = vpop.f32.mrb[8].mxu0  ;;  %v1475_v36 = vpop.f32.mrb[20].mxu1 }
 0xbf6   :  { %v1886_v39 = vadd.f32 %v1885_v32, %v1364_v52  ;;  %v1476_v61 = vadd.f32 %v1721_v33, %v1475_v36  ;;  %v1863_v29 = vpop.f32.mrb[9].mxu0  ;;  %v1883_v40 = vpop.f32.mrb[21].mxu1 }
 0xbf7   :  { %v1367_v41 = vpop.f32.mrb[10].mxu0  ;;  %v1478_v62 = vpop.f32.mrb[22].mxu1 }
 0xbf8   :  { %v1482_v43 = vsub.f32 %v1886_v39, %v1476_v61  ;;  %v1864_v44 = vpop.f32.mrb[11].mxu0  ;;  %v1884_v45 = vpop.f32.mrb[23].mxu1 }
 0xbfa   :  { %v1496_v49 = vrot.slane %v1482_v43, 1  ;;  %v1524_v17 = vadd.f32 %v1522_v42, %v1482_v43  ;;  %v1499_v37 = vadd.f32 %v1493_v46, %v1482_v43  ;;  %v1558_v60 = vadd.f32 %v1556_v48, %v1482_v43 }
 0xbfb   :  { %v1582_v0 = vadd.f32 %v1580_v55, %v1482_v43 }
 0xbfc   :  { %v1525_v56 = vadd.f32 %v1523_v47, %v1496_v49  ;;  %v1500_v57 = vadd.f32 %v1496_v49, %v1494_v50  ;;  %v1559_v58 = vadd.f32 %v1557_v54, %v1496_v49  ;;  %v1583_v59 = vadd.f32 %v1581_v53, %v1496_v49 }
 0xbfd   :  { %v1526_v3 = vmul.f32 %v1524_v17, %v1524_v17  ;;  %v1501_v5 = vmul.f32 %v1499_v37, %v1499_v37  ;;  %v1560_v8 = vmul.f32 %v1558_v60, %v1558_v60  ;;  %v1584_v10 = vmul.f32 %v1582_v0, %v1582_v0 }
 0xbfe   :  { %v1527_v63 = vmul.f32 %v1525_v56, %v1525_v56  ;;  %v1502_v1 = vmul.f32 %v1500_v57, %v1500_v57  ;;  %v1561_v2 = vmul.f32 %v1559_v58, %v1559_v58  ;;  %v1585_v51 = vmul.f32 %v1583_v59, %v1583_v59 }
 0xc00   :  { %v1530_v4 = vrot.slane %v1527_v63, 7  ;;  %v1505_v23 = vrot.slane %v1502_v1, 7  ;;  %v1564_v6 = vrot.slane %v1561_v2, 7  ;;  %v1588_v7 = vrot.slane %v1585_v51, 7 }
 0xc02   :  { %v1531_v9 = vsel %vm92_vm0, %v1530_v4, %v1526_v3  ;;  %v1506_v12 = vsel %vm92_vm0, %v1505_v23, %v1501_v5  ;;  %v1565_v14 = vsel %vm92_vm0, %v1564_v6, %v1560_v8  ;;  %v1589_v15 = vsel %vm92_vm0, %v1588_v7, %v1584_v10 }
 0xc03   :  { %v1533_v11 = vsel %vm1508_vm13, %v1531_v9, 0.0  ;;  %v1509_v13 = vsel %vm1508_vm13, %v1506_v12, 0.0  ;;  %v1567_v16 = vsel %vm1508_vm13, %v1565_v14, 0.0  ;;  %v1591_v18 = vsel %vm1508_vm13, %v1589_v15, 0.0 }
 0xc04   :  { %1534 = vadd.xlane.f32.xlu0 %v1533_v11  ;;  %1510 = vadd.xlane.f32.xlu1 %v1509_v13 }
 0xc08   :  { %1568 = vadd.xlane.f32.xlu0 %v1567_v16  ;;  %1592 = vadd.xlane.f32.xlu1 %v1591_v18 }
 0xc91   :  { %v1535_v19 = vpop.xlane.xlu0 %1534  ;;  %v1511_v20 = vpop.xlane.xlu1 %1510 }
 0xc92   :  { %v1536_v38 = vsel %vm653_vm8, %v1511_v20, %v1535_v19 }
 0xc93   :  { %2047 = vrsqrt.f32 %v1536_v38  ;;  %vm1539_vm14 = vcmp.eq.f32.partialorder %v1536_v38, inf  ;;  %v1542_v27 = vand.u32 2147483648, %v1536_v38  ;;  %vm1541_vm15 = vcmp.eq.f32.partialorder %v1536_v38, 0.0 }
 0xc95   :  { %v1569_v21 = vpop.xlane.xlu0 %1568  ;;  %v1593_v22 = vpop.xlane.xlu1 %1592 }
 0xc96   :  { %v1594_v24 = vsel %vm653_vm8, %v1569_v21, %v1593_v22 }
 0xc97   :  { %2049 = vrsqrt.f32 %v1594_v24  ;;  %vm1597_vm0 = vcmp.eq.f32.partialorder %v1594_v24, inf  ;;  %v1600_v34 = vand.u32 2147483648, %v1594_v24  ;;  %vm1599_vm1 = vcmp.eq.f32.partialorder %v1594_v24, 0.0 }
 0xc9d   :  { %v2048_v25 = vpop.eup %2047 }
 0xc9e   :  { %v1538_v28 = vmul.f32 %v2048_v25, %v1536_v38 }
 0xca0   :  { %v1540_v26 = vsel %vm1539_vm14, %v1536_v38, %v1538_v28 }
 0xca1   :  { %v2050_v30 = vpop.eup %2049  ;;  %v1543_v31 = vsel %vm1541_vm15, %v1542_v27, %v1540_v26 }
 0xca2   :  { %v1544_v32 = vsub.f32 0.0, %v1543_v31  ;;  %v1596_v33 = vmul.f32 %v2050_v30, %v1594_v24 }
 0xca4   :  { %1545 = vst.msk [vmem:[#allocation2] sm:$0x3] %vm655_vm12, %v1544_v32  ;;  %v1598_v35 = vsel %vm1597_vm0, %v1594_v24, %v1596_v33 }
 0xca5   :  { %2062 = shalt.err (!%p2059_p4)
}
 0xca6   :  { %s2063_s15 = scalar_lea.hbm %s2769_s25, 32 }
 0xca7   :  { %p2064_p5 = scmp.ne.s32.totalorder %s2769_s25, %s2063_s15  ;;  %p2067_p6 = scmp.lt.u32.totalorder %s2063_s15, %s2769_s25 }
 0xca9   :  { %p2069_p7 = pnand %p2067_p6, %p2064_p5 }
 0xcab   :  { %2072 = shalt.err (!%p2069_p7)
}
 0xcac   :  { %1613 = dma.vmem_to_hbm [thread:$0]  %s1611_s24, 32, %s2769_s25, [#allocation3]   ;;  %v1601_v52 = vsel %vm1599_vm1, %v1600_v34, %v1598_v35 }
 0xcad   :  { %v1602_v36 = vsub.f32 0.0, %v1601_v52  ;;  %s2073_s16 = scalar_lea.vmem %s1621_s27, 32  ;;  %p2078_p9 = scmp.lt.s32.totalorder %s1621_s27, %s1621_s27 }
 0xcae   :  { %p2074_p8 = scmp.ne.s32.totalorder %s1621_s27, %s2073_s16  ;;  %p2079_p10 = scmp.lt.s32.totalorder %s2073_s16, %s2073_s16 }
 0xcaf   :  { %1603 = vst.msk [vmem:[#allocation4] sm:$0x3] %vm655_vm12, %v1602_v36 }
 0xcb0   :  { %p2080_p11 = por %p2079_p10, %p2078_p9 }
 0xcb2   :  { %p2081_p12 = pnand %p2080_p11, %p2074_p8 }
 0xcb4   :  { %2084 = shalt.err (!%p2081_p12)
}
 0xcb5   :  { %s2085_s18 = scalar_lea.hbm %s2770_s26, 32 }
 0xcb6   :  { %p2086_p13 = scmp.ne.s32.totalorder %s2770_s26, %s2085_s18  ;;  %p2089_p0 = scmp.lt.u32.totalorder %s2085_s18, %s2770_s26 }
 0xcb8   :  { %p2091_p1 = pnand %p2089_p0, %p2086_p13 }
 0xcba   :  { %2094 = shalt.err (!%p2091_p1)
}
 0xcbb   :  { %1623 = dma.vmem_to_hbm [thread:$0]  %s1621_s27, 32, %s2770_s26, [#allocation5]  }
 0xcbc   :  { %2095 = dma.done.wait [#allocation3], 32  }
 0xcbd   :  { %2096 = vsyncadd [#allocation3], 4294967264 }
 0xcbe   :  { %2097 = dma.done.wait [#allocation5], 32  }
 0xcbf   :  { %2098 = vsyncadd [#allocation5], 4294967264 }
 0xcc0   :  { %1630 = vsyncpa [#allocation3], 1 }
 0xcc1   :  { %1631 = vsyncpa [#allocation5], 1 }

</bundles_post_ra>
